<compile_context>
chip_gen: v6e
topology: v6e:2x2x1
jax: 0.10.0
libtpu: 0.0.40
codegen_flags: <defaults>
</compile_context>

<pallas_src>
import functools

import jax
import jax.numpy as jnp
from jax import lax
from jax.experimental import pallas as pl
from jax.experimental.pallas import tpu as pltpu

KSIZE = 5
PAD = 2
NEG_SLOPE = 0.2


def _round_up(x, m):
    return (x + m - 1) // m * m


# ----------------------------------- kernels -----------------------------------
def _tap_kernel(x_ref, w1_ref, b1_ref, w2_ref, b2_ref, out_ref, pad_ref, *, bt, t):
    """Per-tap path: 5 shifted-window (m, C) x (C, C) MXU matmuls per conv."""
    c = pad_ref.shape[-1]
    m = bt * t

    # Zero only the 2+2 halo rows.  Per step (cheap) so the kernel stays correct under
    # megacore "parallel" sharding, where each core owns a private scratch.
    zero_halo = jnp.zeros((bt, PAD, c), dtype=pad_ref.dtype)
    pad_ref[:, pl.ds(0, PAD), :] = zero_halo
    pad_ref[:, pl.ds(PAD + t, PAD), :] = zero_halo

    # Stage the input (bf16) into the padded scratch interior.
    pad_ref[:, pl.ds(PAD, t), :] = x_ref[...].astype(pad_ref.dtype).reshape(bt, t, c)

    # conv1: accumulate straight from the k=0 tap; bias folded into the epilogue.
    acc = jnp.dot(pad_ref[:, pl.ds(0, t), :].reshape(m, c), w1_ref[0],
                  preferred_element_type=jnp.float32)
    for k in range(1, KSIZE):
        acc = acc + jnp.dot(pad_ref[:, pl.ds(k, t), :].reshape(m, c), w1_ref[k],
                            preferred_element_type=jnp.float32)
    acc = acc + b1_ref[...]                        # (1, c) bias, fused epilogue
    h = jnp.where(acc >= 0, acc, NEG_SLOPE * acc)  # LeakyReLU(0.2)

    # Reuse the (still zero-haloed) scratch as conv2's padded input.
    pad_ref[:, pl.ds(PAD, t), :] = h.astype(pad_ref.dtype).reshape(bt, t, c)

    acc2 = jnp.dot(pad_ref[:, pl.ds(0, t), :].reshape(m, c), w2_ref[0],
                   preferred_element_type=jnp.float32)
    for k in range(1, KSIZE):
        acc2 = acc2 + jnp.dot(pad_ref[:, pl.ds(k, t), :].reshape(m, c), w2_ref[k],
                              preferred_element_type=jnp.float32)

    # Residual add + conv2 bias in one f32 elementwise pass.
    out_ref[...] = (x_ref[...] + acc2 + b2_ref[...]).astype(out_ref.dtype)


def _im2col_kernel(x_ref, w1_ref, b1_ref, w2_ref, b2_ref, out_ref,
                   pad_ref, col_ref, *, bt, t):
    """Small-C path: fuse the 5 taps into one (m, 5C) x (5C, C) matmul per conv."""
    c = pad_ref.shape[-1]
    m = bt * t

    zero_halo = jnp.zeros((bt, PAD, c), dtype=pad_ref.dtype)
    pad_ref[:, pl.ds(0, PAD), :] = zero_halo
    pad_ref[:, pl.ds(PAD + t, PAD), :] = zero_halo
    pad_ref[:, pl.ds(PAD, t), :] = x_ref[...].astype(pad_ref.dtype).reshape(bt, t, c)

    w1 = w1_ref[...].reshape(KSIZE * c, c)   # (k, c_in, c_out) -> (k*c_in, c_out)
    w2 = w2_ref[...].reshape(KSIZE * c, c)

    for k in range(KSIZE):                   # im2col slab: col[:, kC:(k+1)C] = x[t+k]
        col_ref[:, pl.ds(k * c, c)] = pad_ref[:, pl.ds(k, t), :].reshape(m, c)
    acc = jnp.dot(col_ref[...], w1, preferred_element_type=jnp.float32)
    acc = acc + b1_ref[...]
    h = jnp.where(acc >= 0, acc, NEG_SLOPE * acc)

    pad_ref[:, pl.ds(PAD, t), :] = h.astype(pad_ref.dtype).reshape(bt, t, c)
    for k in range(KSIZE):
        col_ref[:, pl.ds(k * c, c)] = pad_ref[:, pl.ds(k, t), :].reshape(m, c)
    acc2 = jnp.dot(col_ref[...], w2, preferred_element_type=jnp.float32)

    out_ref[...] = (x_ref[...] + acc2 + b2_ref[...]).astype(out_ref.dtype)


# ----------------------------------- helpers -----------------------------------
def _choose_batch_tile(n, t, target_rows=1024):
    """Largest useful batch fold: bt | N, (bt*T) % 8 == 0 (or bt == N), grid length
    >= 2 when N >= 2 (keeps both v7x TensorCores busy), and M = bt*T near target."""
    candidates = [bt for bt in range(1, n + 1)
                  if n % bt == 0 and ((bt * t) % 8 == 0 or bt == n)]

    def score(bt):
        grid_pen = 0 if (n // bt >= 2 or n == 1) else 1
        return (grid_pen, abs(bt * t - target_rows))

    return min(candidates, key=score)


def _resident_spec(block_shape, index_map, single_buffer):
    """BlockSpec for grid-invariant operands (constant index_map): single-buffered so
    the useless second weight buffer is dropped (halves resident-weight VMEM)."""
    if single_buffer:
        try:
            return pl.BlockSpec(block_shape, index_map, pipeline_mode=pl.Buffered(1))
        except (TypeError, AttributeError):
            pass
    return pl.BlockSpec(block_shape, index_map)


def _vmem_limit_bytes(m, c, bt, t_pad, x_bytes, use_im2col, single_buffer_weights):
    wbuf = 1 if single_buffer_weights else 2
    need = wbuf * (2 * KSIZE * c * c * 2 + 2 * c * 4)   # bf16 weights + f32 biases
    need += 2 * 2 * m * c * x_bytes                     # x + out blocks, double-buffered
    need += bt * t_pad * c * 2                          # padded-activation scratch (bf16)
    if use_im2col:
        need += m * KSIZE * c * 2                       # im2col slab (bf16)
    need += 8 * 1024 * 1024                             # Mosaic internal-scratch headroom
    return int(min(128 * 1024 * 1024, max(32 * 1024 * 1024, need)))


# ----------------------------------- wrappers -----------------------------------
@functools.partial(
    jax.jit, static_argnames=("batch_tile", "use_im2col", "single_buffer_weights"))
def scyclone_d_block_ntc(x, w1, b1, w2, b2, *, batch_tile=None, use_im2col=None,
                         single_buffer_weights=True):
    """Channels-last Scyclone D block: y = x + conv2(leaky_relu_0.2(conv1(x))).

    x      : (N, T, C) — channels last so C sits on the 128-wide lane axis.  f32 or
             bf16 (bf16 halves HBM traffic; accumulation stays f32 either way).
    w1, w2 : (5, C, C) spectral-normalized conv weights, (k, c_in, c_out) layout.
    b1, b2 : (C,) biases.
    batch_tile : sequences folded per grid step (MXU M = batch_tile*T).  Default
             auto-picks M ~ 1024 rows while keeping grid length >= 2 (v7x dual-TC);
             on single-core v5e/v6e it can be raised to fold the batch maximally.
    use_im2col : fuse the 5 taps into one K=5C matmul (default: only when C == 128).
    """
    n, t, c = x.shape
    if batch_tile is None:
        batch_tile = _choose_batch_tile(n, t)
    assert n % batch_tile == 0, "batch_tile must divide N"
    m = batch_tile * t
    assert m % 8 == 0 or batch_tile == n, "batch_tile*T must be a multiple of 8"
    if use_im2col is None:
        use_im2col = (c == 128)   # small C: one deep K=5C contraction fills the MXU

    x2 = x.reshape(n * t, c)            # free contiguous reshape, no extra HBM pass
    w1b = w1.astype(jnp.bfloat16)       # no-op if weights are already stored as bf16
    w2b = w2.astype(jnp.bfloat16)
    b1r = b1.reshape(1, c).astype(jnp.float32)
    b2r = b2.reshape(1, c).astype(jnp.float32)

    t_pad = _round_up(t + 2 * PAD, 16)  # bf16 sublane pack
    grid = (n // batch_tile,)

    kernel = _im2col_kernel if use_im2col else _tap_kernel
    kernel = functools.partial(kernel, bt=batch_tile, t=t)

    scratch_shapes = [pltpu.VMEM((batch_tile, t_pad, c), jnp.bfloat16)]
    if use_im2col:
        scratch_shapes.append(pltpu.VMEM((m, KSIZE * c), jnp.bfloat16))

    flops = 2 * 2 * n * t * c * c * KSIZE          # two convs, 2*M*K*N each
    bytes_accessed = (2 * n * t * c * x.dtype.itemsize
                      + 2 * KSIZE * c * c * 2 + 2 * c * 4)
    cost = pl.CostEstimate(flops=flops, transcendentals=0,
                           bytes_accessed=bytes_accessed)

    # NOTE(perf): C should be a multiple of 128 (lane-dense stores, full MXU columns).
    # For the real model's C=1026, pad to 1152 with pad_channels_for_lane_density()
    # (zero-padded weights/bias keep the math exact) and slice [..., :1026] afterwards.
    out2 = pl.pallas_call(
        kernel,
        out_shape=jax.ShapeDtypeStruct((n * t, c), x.dtype),
        grid_spec=pltpu.PrefetchScalarGridSpec(
            num_scalar_prefetch=0,
            grid=grid,
            in_specs=[
                pl.BlockSpec((m, c), lambda i: (i, 0)),
                _resident_spec((KSIZE, c, c), lambda i: (0, 0, 0), single_buffer_weights),
                _resident_spec((1, c), lambda i: (0, 0), single_buffer_weights),
                _resident_spec((KSIZE, c, c), lambda i: (0, 0, 0), single_buffer_weights),
                _resident_spec((1, c), lambda i: (0, 0), single_buffer_weights),
            ],
            out_specs=pl.BlockSpec((m, c), lambda i: (i, 0)),
            scratch_shapes=scratch_shapes,
        ),
        compiler_params=pltpu.CompilerParams(
            dimension_semantics=("parallel",),
            vmem_limit_bytes=_vmem_limit_bytes(
                m, c, batch_tile, t_pad, x.dtype.itemsize, use_im2col,
                single_buffer_weights),
        ),
        cost_estimate=cost,
    )(x2, w1b, b1r, w2b, b2r)

    return out2.reshape(n, t, c)


def scyclone_d_block(x_nct, w1, b1, w2, b2, **kwargs):
    """Drop-in wrapper with the PyTorch NCW interface (N, C, T).  Channels-last
    pipelines should call scyclone_d_block_ntc directly and skip these transposes."""
    out_ntc = scyclone_d_block_ntc(
        jnp.transpose(x_nct, (0, 2, 1)), w1, b1, w2, b2, **kwargs)
    return jnp.transpose(out_ntc, (0, 2, 1))


def pad_channels_for_lane_density(x_ntc, w_list, b_list, c_pad):
    """Zero-pad channels to a lane-dense width (e.g. 1026 -> 1152) without changing
    the math: padded weight rows/columns and bias entries are zero, so padded output
    channels are exactly zero (residual-safe); slice [..., :C] off the result."""
    c = x_ntc.shape[-1]
    dc = c_pad - c
    x_p = jnp.pad(x_ntc, ((0, 0), (0, 0), (0, dc)))
    w_p = [jnp.pad(w, ((0, 0), (0, dc), (0, dc))) for w in w_list]
    b_p = [jnp.pad(b, ((0, dc),)) for b in b_list]
    return x_p, w_p, b_p


# ----------------- parameter construction (deterministic, synthetic) -----------------
def make_spectral_norm_conv_params(key, c):
    """Conv1d(C, C, 5) weight/bias with spectral normalization applied exactly.
    PyTorch's spectral_norm uses power iteration; here the exact top singular value of
    the (c_out, c_in*k) matrix is used (== converged power iteration)."""
    kw, kb = jax.random.split(key)
    fan_in = c * KSIZE
    bound = 1.0 / jnp.sqrt(fan_in)
    w_torch = jax.random.uniform(kw, (c, c, KSIZE), jnp.float32, -bound, bound)
    b = jax.random.uniform(kb, (c,), jnp.float32, -bound, bound)
    sigma = jnp.linalg.norm(w_torch.reshape(c, c * KSIZE), ord=2)
    w_torch = w_torch / sigma
    w_kernel = jnp.transpose(w_torch, (2, 1, 0)).astype(jnp.bfloat16)
    return w_kernel, b, w_torch


def reference_forward(x_nct, w1_torch, b1, w2_torch, b2):
    """Pure-JAX f32 reference using lax.conv_general_dilated (NCW / OIW)."""
    dn = ("NCH", "OIH", "NCH")
    h = lax.conv_general_dilated(x_nct, w1_torch, window_strides=(1,),
                                 padding=[(PAD, PAD)], dimension_numbers=dn)
    h = h + b1[None, :, None]
    h = jnp.where(h >= 0, h, NEG_SLOPE * h)
    y = lax.conv_general_dilated(h, w2_torch, window_strides=(1,),
                                 padding=[(PAD, PAD)], dimension_numbers=dn)
    y = y + b2[None, :, None]
    return x_nct + y


def _run(fn, *args, **kwargs):
    try:
        return jax.block_until_ready(fn(*args, **kwargs))
    except Exception:
        # pl.Buffered(1) (single-buffered resident weights) may not lower on every
        # jax/libtpu combination; retry with default double-buffering.
        return jax.block_until_ready(fn(*args, single_buffer_weights=False, **kwargs))


if __name__ == "__main__":
    key = jax.random.PRNGKey(0)
    kx, k1, k2, kx2, k3, k4, kx3, k5, k6 = jax.random.split(key, 9)
    tol = 6e-2   # bf16 tap matmuls + bf16 intermediate vs. the f32 reference

    # --- 1) main path: C == 128 (lane-dense) -> im2col fused-K kernel --------------
    N, C, T = 2, 128, 16
    x_nct = jax.random.normal(kx, (N, C, T), jnp.float32)     # module-native NCW
    x_ntc = jnp.transpose(x_nct, (0, 2, 1))                   # channels-last path
    w1, b1, w1_t = make_spectral_norm_conv_params(k1, C)
    w2, b2, w2_t = make_spectral_norm_conv_params(k2, C)
    ref_ntc = jnp.transpose(reference_forward(x_nct, w1_t, b1, w2_t, b2), (0, 2, 1))

    out_ntc = _run(scyclone_d_block_ntc, x_ntc, w1, b1, w2, b2)
    assert out_ntc.shape == (N, T, C)
    err1 = float(jnp.max(jnp.abs(out_ntc - ref_ntc)))
    assert err1 < tol, err1

    # NCW drop-in wrapper (module interface parity; reuses the same compile).
    out_nct = _run(scyclone_d_block, x_nct, w1, b1, w2, b2)
    err2 = float(jnp.max(jnp.abs(out_nct - jnp.transpose(ref_ntc, (0, 2, 1)))))
    assert err2 < tol, err2

    # --- 2) larger-C configuration -> per-tap matmul kernel -------------------------
    C2, T2 = 256, 8
    x2_nct = jax.random.normal(kx2, (N, C2, T2), jnp.float32)
    w3, b3, w3_t = make_spectral_norm_conv_params(k3, C2)
    w4, b4, w4_t = make_spectral_norm_conv_params(k4, C2)
    ref2 = reference_forward(x2_nct, w3_t, b3, w4_t, b4)
    out2 = _run(scyclone_d_block, x2_nct, w3, b3, w4, b4)
    err3 = float(jnp.max(jnp.abs(out2 - ref2)))
    assert err3 < tol, err3

    # --- 3) non-lane-dense C via correctness-preserving channel padding -------------
    # (stands in for the real model's C=1026 -> 1152; reuses the C=128 compile).
    C3 = 96
    x3_nct = jax.random.normal(kx3, (N, C3, T), jnp.float32)
    w5, b5, w5_t = make_spectral_norm_conv_params(k5, C3)
    w6, b6, w6_t = make_spectral_norm_conv_params(k6, C3)
    ref3 = jnp.transpose(reference_forward(x3_nct, w5_t, b5, w6_t, b6), (0, 2, 1))
    x3_p, (w5_p, w6_p), (b5_p, b6_p) = pad_channels_for_lane_density(
        jnp.transpose(x3_nct, (0, 2, 1)), [w5, w6], [b5, b6], 128)
    out3 = _run(scyclone_d_block_ntc, x3_p, w5_p, b5_p, w6_p, b6_p)[..., :C3]
    err4 = float(jnp.max(jnp.abs(out3 - ref3)))
    assert err4 < tol, err4

    print("KERNEL_OK")
</pallas_src>

<mosaic_0001>
module attributes {stable_mosaic.version = 11 : i64} {
  func.func @_im2col_kernel(%arg0: i32, %arg1: memref<16x128xf32, #tpu.memory_space<vmem>>, %arg2: memref<5x128x128xbf16, #tpu.memory_space<vmem>>, %arg3: memref<1x128xf32, #tpu.memory_space<vmem>>, %arg4: memref<5x128x128xbf16, #tpu.memory_space<vmem>>, %arg5: memref<1x128xf32, #tpu.memory_space<vmem>>, %arg6: memref<16x128xf32, #tpu.memory_space<vmem>>, %arg7: memref<1x32x128xbf16, #tpu.memory_space<vmem>>, %arg8: memref<16x640xbf16, #tpu.memory_space<vmem>>) attributes {dimension_semantics = [#tpu.dimension_semantics<parallel>], iteration_bounds = array<i64: 2>, scalar_prefetch = 0 : i64, scratch_operands = 2 : i64, tpu.core_type = #tpu.core_type<tc>, window_params = [{transform_indices = @transform_0, window_bounds = array<i64: 16, 128>}, {pipeline_mode = #tpu.pipeline_mode<synchronous>, transform_indices = @transform_1, window_bounds = array<i64: 5, 128, 128>}, {pipeline_mode = #tpu.pipeline_mode<synchronous>, transform_indices = @transform_2, window_bounds = array<i64: 1, 128>}, {pipeline_mode = #tpu.pipeline_mode<synchronous>, transform_indices = @transform_3, window_bounds = array<i64: 5, 128, 128>}, {pipeline_mode = #tpu.pipeline_mode<synchronous>, transform_indices = @transform_4, window_bounds = array<i64: 1, 128>}, {transform_indices = @transform_5, window_bounds = array<i64: 16, 128>}]} {
    %cst = arith.constant 0.000000e+00 : bf16
    %0 = vector.broadcast %cst : bf16 to vector<1x2x128xbf16>
    %c0 = arith.constant 0 : index
    %c0_0 = arith.constant 0 : index
    %c0_1 = arith.constant 0 : index
    %1 = vector.load %arg7[%c0, %c0_0, %c0_1] : memref<1x32x128xbf16, #tpu.memory_space<vmem>>, vector<1x2x128xbf16>
    tpu.vector_store %arg7[%c0, %c0_0, %c0_1], %0 {strides = array<i32>} : memref<1x32x128xbf16, #tpu.memory_space<vmem>>, vector<1x2x128xbf16>,
    %c0_2 = arith.constant 0 : index
    %c18 = arith.constant 18 : index
    %c0_3 = arith.constant 0 : index
    %2 = vector.load %arg7[%c0_2, %c18, %c0_3] : memref<1x32x128xbf16, #tpu.memory_space<vmem>>, vector<1x2x128xbf16>
    tpu.vector_store %arg7[%c0_2, %c18, %c0_3], %0 {strides = array<i32>} : memref<1x32x128xbf16, #tpu.memory_space<vmem>>, vector<1x2x128xbf16>,
    %c0_4 = arith.constant 0 : index
    %c0_5 = arith.constant 0 : index
    %3 = vector.load %arg1[%c0_4, %c0_5] : memref<16x128xf32, #tpu.memory_space<vmem>>, vector<16x128xf32>
    %4 = arith.truncf %3 : vector<16x128xf32> to vector<16x128xbf16>
    %5 = vector.shape_cast %4 : vector<16x128xbf16> to vector<1x16x128xbf16>
    %c0_6 = arith.constant 0 : index
    %c2 = arith.constant 2 : index
    %c0_7 = arith.constant 0 : index
    %6 = vector.load %arg7[%c0_6, %c2, %c0_7] : memref<1x32x128xbf16, #tpu.memory_space<vmem>>, vector<1x16x128xbf16>
    tpu.vector_store %arg7[%c0_6, %c2, %c0_7], %5 {strides = array<i32>} : memref<1x32x128xbf16, #tpu.memory_space<vmem>>, vector<1x16x128xbf16>,
    %c0_8 = arith.constant 0 : index
    %c0_9 = arith.constant 0 : index
    %c0_10 = arith.constant 0 : index
    %7 = vector.load %arg2[%c0_8, %c0_9, %c0_10] : memref<5x128x128xbf16, #tpu.memory_space<vmem>>, vector<5x128x128xbf16>
    %8 = vector.shape_cast %7 : vector<5x128x128xbf16> to vector<640x128xbf16>
    %c0_11 = arith.constant 0 : index
    %c0_12 = arith.constant 0 : index
    %c0_13 = arith.constant 0 : index
    %9 = vector.load %arg4[%c0_11, %c0_12, %c0_13] : memref<5x128x128xbf16, #tpu.memory_space<vmem>>, vector<5x128x128xbf16>
    %10 = vector.shape_cast %9 : vector<5x128x128xbf16> to vector<640x128xbf16>
    %c0_14 = arith.constant 0 : index
    %c0_15 = arith.constant 0 : index
    %c0_16 = arith.constant 0 : index
    %11 = vector.load %arg7[%c0_14, %c0_15, %c0_16] : memref<1x32x128xbf16, #tpu.memory_space<vmem>>, vector<1x16x128xbf16>
    %12 = vector.shape_cast %11 : vector<1x16x128xbf16> to vector<16x128xbf16>
    %c0_17 = arith.constant 0 : index
    %c0_18 = arith.constant 0 : index
    %13 = vector.load %arg8[%c0_17, %c0_18] : memref<16x640xbf16, #tpu.memory_space<vmem>>, vector<16x128xbf16>
    tpu.vector_store %arg8[%c0_17, %c0_18], %12 {strides = array<i32>} : memref<16x640xbf16, #tpu.memory_space<vmem>>, vector<16x128xbf16>,
    %c0_19 = arith.constant 0 : index
    %c1 = arith.constant 1 : index
    %c0_20 = arith.constant 0 : index
    %14 = vector.load %arg7[%c0_19, %c1, %c0_20] : memref<1x32x128xbf16, #tpu.memory_space<vmem>>, vector<1x16x128xbf16>
    %15 = vector.shape_cast %14 : vector<1x16x128xbf16> to vector<16x128xbf16>
    %c0_21 = arith.constant 0 : index
    %c128 = arith.constant 128 : index
    %16 = vector.load %arg8[%c0_21, %c128] : memref<16x640xbf16, #tpu.memory_space<vmem>>, vector<16x128xbf16>
    tpu.vector_store %arg8[%c0_21, %c128], %15 {strides = array<i32>} : memref<16x640xbf16, #tpu.memory_space<vmem>>, vector<16x128xbf16>,
    %c0_22 = arith.constant 0 : index
    %c2_23 = arith.constant 2 : index
    %c0_24 = arith.constant 0 : index
    %17 = vector.load %arg7[%c0_22, %c2_23, %c0_24] : memref<1x32x128xbf16, #tpu.memory_space<vmem>>, vector<1x16x128xbf16>
    %18 = vector.shape_cast %17 : vector<1x16x128xbf16> to vector<16x128xbf16>
    %c0_25 = arith.constant 0 : index
    %c256 = arith.constant 256 : index
    %19 = vector.load %arg8[%c0_25, %c256] : memref<16x640xbf16, #tpu.memory_space<vmem>>, vector<16x128xbf16>
    tpu.vector_store %arg8[%c0_25, %c256], %18 {strides = array<i32>} : memref<16x640xbf16, #tpu.memory_space<vmem>>, vector<16x128xbf16>,
    %c0_26 = arith.constant 0 : index
    %c3 = arith.constant 3 : index
    %c0_27 = arith.constant 0 : index
    %20 = vector.load %arg7[%c0_26, %c3, %c0_27] : memref<1x32x128xbf16, #tpu.memory_space<vmem>>, vector<1x16x128xbf16>
    %21 = vector.shape_cast %20 : vector<1x16x128xbf16> to vector<16x128xbf16>
    %c0_28 = arith.constant 0 : index
    %c384 = arith.constant 384 : index
    %22 = vector.load %arg8[%c0_28, %c384] : memref<16x640xbf16, #tpu.memory_space<vmem>>, vector<16x128xbf16>
    tpu.vector_store %arg8[%c0_28, %c384], %21 {strides = array<i32>} : memref<16x640xbf16, #tpu.memory_space<vmem>>, vector<16x128xbf16>,
    %c0_29 = arith.constant 0 : index
    %c4 = arith.constant 4 : index
    %c0_30 = arith.constant 0 : index
    %23 = vector.load %arg7[%c0_29, %c4, %c0_30] : memref<1x32x128xbf16, #tpu.memory_space<vmem>>, vector<1x16x128xbf16>
    %24 = vector.shape_cast %23 : vector<1x16x128xbf16> to vector<16x128xbf16>
    %c0_31 = arith.constant 0 : index
    %c512 = arith.constant 512 : index
    %25 = vector.load %arg8[%c0_31, %c512] : memref<16x640xbf16, #tpu.memory_space<vmem>>, vector<16x128xbf16>
    tpu.vector_store %arg8[%c0_31, %c512], %24 {strides = array<i32>} : memref<16x640xbf16, #tpu.memory_space<vmem>>, vector<16x128xbf16>,
    %c0_32 = arith.constant 0 : index
    %c0_33 = arith.constant 0 : index
    %26 = vector.load %arg8[%c0_32, %c0_33] : memref<16x640xbf16, #tpu.memory_space<vmem>>, vector<16x640xbf16>
    %cst_34 = arith.constant dense<0.000000e+00> : vector<16x128xf32>
    %27 = tpu.matmul %26, %8, %cst_34 {dimension_numbers = #tpu.dot_dimension_numbers<[1], [0], [0], [1], [0, 0, 1, 1], [], []>} : vector<16x640xbf16>, vector<640x128xbf16>, vector<16x128xf32> -> vector<16x128xf32>
    %c0_35 = arith.constant 0 : index
    %c0_36 = arith.constant 0 : index
    %28 = vector.load %arg3[%c0_35, %c0_36] : memref<1x128xf32, #tpu.memory_space<vmem>>, vector<1x128xf32>
    %29 = vector.broadcast %28 : vector<1x128xf32> to vector<16x128xf32>
    %30 = arith.addf %27, %29 : vector<16x128xf32>
    %cst_37 = arith.constant 0.000000e+00 : f32
    %31 = vector.broadcast %cst_37 : f32 to vector<16x128xf32>
    %32 = arith.cmpf oge, %30, %31 : vector<16x128xf32>
    %cst_38 = arith.constant 2.000000e-01 : f32
    %33 = vector.broadcast %cst_38 : f32 to vector<16x128xf32>
    %34 = arith.mulf %33, %30 : vector<16x128xf32>
    %35 = arith.select %32, %30, %34 : vector<16x128xi1>, vector<16x128xf32>
    %36 = arith.truncf %35 : vector<16x128xf32> to vector<16x128xbf16>
    %37 = vector.shape_cast %36 : vector<16x128xbf16> to vector<1x16x128xbf16>
    %c0_39 = arith.constant 0 : index
    %c2_40 = arith.constant 2 : index
    %c0_41 = arith.constant 0 : index
    %38 = vector.load %arg7[%c0_39, %c2_40, %c0_41] : memref<1x32x128xbf16, #tpu.memory_space<vmem>>, vector<1x16x128xbf16>
    tpu.vector_store %arg7[%c0_39, %c2_40, %c0_41], %37 {strides = array<i32>} : memref<1x32x128xbf16, #tpu.memory_space<vmem>>, vector<1x16x128xbf16>,
    %c0_42 = arith.constant 0 : index
    %c0_43 = arith.constant 0 : index
    %c0_44 = arith.constant 0 : index
    %39 = vector.load %arg7[%c0_42, %c0_43, %c0_44] : memref<1x32x128xbf16, #tpu.memory_space<vmem>>, vector<1x16x128xbf16>
    %40 = vector.shape_cast %39 : vector<1x16x128xbf16> to vector<16x128xbf16>
    %c0_45 = arith.constant 0 : index
    %c0_46 = arith.constant 0 : index
    %41 = vector.load %arg8[%c0_45, %c0_46] : memref<16x640xbf16, #tpu.memory_space<vmem>>, vector<16x128xbf16>
    tpu.vector_store %arg8[%c0_45, %c0_46], %40 {strides = array<i32>} : memref<16x640xbf16, #tpu.memory_space<vmem>>, vector<16x128xbf16>,
    %c0_47 = arith.constant 0 : index
    %c1_48 = arith.constant 1 : index
    %c0_49 = arith.constant 0 : index
    %42 = vector.load %arg7[%c0_47, %c1_48, %c0_49] : memref<1x32x128xbf16, #tpu.memory_space<vmem>>, vector<1x16x128xbf16>
    %43 = vector.shape_cast %42 : vector<1x16x128xbf16> to vector<16x128xbf16>
    %c0_50 = arith.constant 0 : index
    %c128_51 = arith.constant 128 : index
    %44 = vector.load %arg8[%c0_50, %c128_51] : memref<16x640xbf16, #tpu.memory_space<vmem>>, vector<16x128xbf16>
    tpu.vector_store %arg8[%c0_50, %c128_51], %43 {strides = array<i32>} : memref<16x640xbf16, #tpu.memory_space<vmem>>, vector<16x128xbf16>,
    %c0_52 = arith.constant 0 : index
    %c2_53 = arith.constant 2 : index
    %c0_54 = arith.constant 0 : index
    %45 = vector.load %arg7[%c0_52, %c2_53, %c0_54] : memref<1x32x128xbf16, #tpu.memory_space<vmem>>, vector<1x16x128xbf16>
    %46 = vector.shape_cast %45 : vector<1x16x128xbf16> to vector<16x128xbf16>
    %c0_55 = arith.constant 0 : index
    %c256_56 = arith.constant 256 : index
    %47 = vector.load %arg8[%c0_55, %c256_56] : memref<16x640xbf16, #tpu.memory_space<vmem>>, vector<16x128xbf16>
    tpu.vector_store %arg8[%c0_55, %c256_56], %46 {strides = array<i32>} : memref<16x640xbf16, #tpu.memory_space<vmem>>, vector<16x128xbf16>,
    %c0_57 = arith.constant 0 : index
    %c3_58 = arith.constant 3 : index
    %c0_59 = arith.constant 0 : index
    %48 = vector.load %arg7[%c0_57, %c3_58, %c0_59] : memref<1x32x128xbf16, #tpu.memory_space<vmem>>, vector<1x16x128xbf16>
    %49 = vector.shape_cast %48 : vector<1x16x128xbf16> to vector<16x128xbf16>
    %c0_60 = arith.constant 0 : index
    %c384_61 = arith.constant 384 : index
    %50 = vector.load %arg8[%c0_60, %c384_61] : memref<16x640xbf16, #tpu.memory_space<vmem>>, vector<16x128xbf16>
    tpu.vector_store %arg8[%c0_60, %c384_61], %49 {strides = array<i32>} : memref<16x640xbf16, #tpu.memory_space<vmem>>, vector<16x128xbf16>,
    %c0_62 = arith.constant 0 : index
    %c4_63 = arith.constant 4 : index
    %c0_64 = arith.constant 0 : index
    %51 = vector.load %arg7[%c0_62, %c4_63, %c0_64] : memref<1x32x128xbf16, #tpu.memory_space<vmem>>, vector<1x16x128xbf16>
    %52 = vector.shape_cast %51 : vector<1x16x128xbf16> to vector<16x128xbf16>
    %c0_65 = arith.constant 0 : index
    %c512_66 = arith.constant 512 : index
    %53 = vector.load %arg8[%c0_65, %c512_66] : memref<16x640xbf16, #tpu.memory_space<vmem>>, vector<16x128xbf16>
    tpu.vector_store %arg8[%c0_65, %c512_66], %52 {strides = array<i32>} : memref<16x640xbf16, #tpu.memory_space<vmem>>, vector<16x128xbf16>,
    %c0_67 = arith.constant 0 : index
    %c0_68 = arith.constant 0 : index
    %54 = vector.load %arg8[%c0_67, %c0_68] : memref<16x640xbf16, #tpu.memory_space<vmem>>, vector<16x640xbf16>
    %cst_69 = arith.constant dense<0.000000e+00> : vector<16x128xf32>
    %55 = tpu.matmul %54, %10, %cst_69 {dimension_numbers = #tpu.dot_dimension_numbers<[1], [0], [0], [1], [0, 0, 1, 1], [], []>} : vector<16x640xbf16>, vector<640x128xbf16>, vector<16x128xf32> -> vector<16x128xf32>
    %c0_70 = arith.constant 0 : index
    %c0_71 = arith.constant 0 : index
    %56 = vector.load %arg1[%c0_70, %c0_71] : memref<16x128xf32, #tpu.memory_space<vmem>>, vector<16x128xf32>
    %57 = arith.addf %56, %55 : vector<16x128xf32>
    %c0_72 = arith.constant 0 : index
    %c0_73 = arith.constant 0 : index
    %58 = vector.load %arg5[%c0_72, %c0_73] : memref<1x128xf32, #tpu.memory_space<vmem>>, vector<1x128xf32>
    %59 = vector.broadcast %58 : vector<1x128xf32> to vector<16x128xf32>
    %60 = arith.addf %57, %59 : vector<16x128xf32>
    %c0_74 = arith.constant 0 : index
    %c0_75 = arith.constant 0 : index
    %61 = vector.load %arg6[%c0_74, %c0_75] : memref<16x128xf32, #tpu.memory_space<vmem>>, vector<16x128xf32>
    tpu.vector_store %arg6[%c0_74, %c0_75], %60 {strides = array<i32>} : memref<16x128xf32, #tpu.memory_space<vmem>>, vector<16x128xf32>,
    return
  }
  func.func @transform_0(%arg0: i32) -> (i32, i32) {
    %c0_i32 = arith.constant 0 : i32
    %c0_i32_0 = arith.constant 0 : i32
    return %arg0, %c0_i32 : i32, i32
  }
  func.func @transform_1(%arg0: i32) -> (i32, i32, i32) {
    %c0_i32 = arith.constant 0 : i32
    %c0_i32_0 = arith.constant 0 : i32
    %c0_i32_1 = arith.constant 0 : i32
    %c0_i32_2 = arith.constant 0 : i32
    return %c0_i32, %c0_i32_0, %c0_i32_1 : i32, i32, i32
  }
  func.func @transform_2(%arg0: i32) -> (i32, i32) {
    %c0_i32 = arith.constant 0 : i32
    %c0_i32_0 = arith.constant 0 : i32
    %c0_i32_1 = arith.constant 0 : i32
    return %c0_i32, %c0_i32_0 : i32, i32
  }
  func.func @transform_3(%arg0: i32) -> (i32, i32, i32) {
    %c0_i32 = arith.constant 0 : i32
    %c0_i32_0 = arith.constant 0 : i32
    %c0_i32_1 = arith.constant 0 : i32
    %c0_i32_2 = arith.constant 0 : i32
    return %c0_i32, %c0_i32_0, %c0_i32_1 : i32, i32, i32
  }
  func.func @transform_4(%arg0: i32) -> (i32, i32) {
    %c0_i32 = arith.constant 0 : i32
    %c0_i32_0 = arith.constant 0 : i32
    %c0_i32_1 = arith.constant 0 : i32
    return %c0_i32, %c0_i32_0 : i32, i32
  }
  func.func @transform_5(%arg0: i32) -> (i32, i32) {
    %c0_i32 = arith.constant 0 : i32
    %c0_i32_0 = arith.constant 0 : i32
    return %arg0, %c0_i32 : i32, i32
  }
}

module attributes {stable_mosaic.version = 11 : i64} {
  func.func @_im2col_kernel(%arg0: i32, %arg1: memref<16x128xf32, #tpu.memory_space<vmem>>, %arg2: memref<5x128x128xbf16, #tpu.memory_space<vmem>>, %arg3: memref<1x128xf32, #tpu.memory_space<vmem>>, %arg4: memref<5x128x128xbf16, #tpu.memory_space<vmem>>, %arg5: memref<1x128xf32, #tpu.memory_space<vmem>>, %arg6: memref<16x128xf32, #tpu.memory_space<vmem>>, %arg7: memref<1x32x128xbf16, #tpu.memory_space<vmem>>, %arg8: memref<16x640xbf16, #tpu.memory_space<vmem>>) attributes {dimension_semantics = [#tpu.dimension_semantics<parallel>], iteration_bounds = array<i64: 2>, scalar_prefetch = 0 : i64, scratch_operands = 2 : i64, tpu.core_type = #tpu.core_type<tc>, window_params = [{transform_indices = @transform_0, window_bounds = array<i64: 16, 128>}, {pipeline_mode = #tpu.pipeline_mode<synchronous>, transform_indices = @transform_1, window_bounds = array<i64: 5, 128, 128>}, {pipeline_mode = #tpu.pipeline_mode<synchronous>, transform_indices = @transform_2, window_bounds = array<i64: 1, 128>}, {pipeline_mode = #tpu.pipeline_mode<synchronous>, transform_indices = @transform_3, window_bounds = array<i64: 5, 128, 128>}, {pipeline_mode = #tpu.pipeline_mode<synchronous>, transform_indices = @transform_4, window_bounds = array<i64: 1, 128>}, {transform_indices = @transform_5, window_bounds = array<i64: 16, 128>}]} {
    %cst = arith.constant 0.000000e+00 : bf16
    %0 = vector.broadcast %cst : bf16 to vector<1x2x128xbf16>
    %c0 = arith.constant 0 : index
    %c0_0 = arith.constant 0 : index
    %c0_1 = arith.constant 0 : index
    %1 = vector.load %arg7[%c0, %c0_0, %c0_1] : memref<1x32x128xbf16, #tpu.memory_space<vmem>>, vector<1x2x128xbf16>
    tpu.vector_store %arg7[%c0, %c0_0, %c0_1], %0 {strides = array<i32>} : memref<1x32x128xbf16, #tpu.memory_space<vmem>>, vector<1x2x128xbf16>,
    %c0_2 = arith.constant 0 : index
    %c18 = arith.constant 18 : index
    %c0_3 = arith.constant 0 : index
    %2 = vector.load %arg7[%c0_2, %c18, %c0_3] : memref<1x32x128xbf16, #tpu.memory_space<vmem>>, vector<1x2x128xbf16>
    tpu.vector_store %arg7[%c0_2, %c18, %c0_3], %0 {strides = array<i32>} : memref<1x32x128xbf16, #tpu.memory_space<vmem>>, vector<1x2x128xbf16>,
    %c0_4 = arith.constant 0 : index
    %c0_5 = arith.constant 0 : index
    %3 = vector.load %arg1[%c0_4, %c0_5] : memref<16x128xf32, #tpu.memory_space<vmem>>, vector<16x128xf32>
    %4 = arith.truncf %3 : vector<16x128xf32> to vector<16x128xbf16>
    %5 = vector.shape_cast %4 : vector<16x128xbf16> to vector<1x16x128xbf16>
    %c0_6 = arith.constant 0 : index
    %c2 = arith.constant 2 : index
    %c0_7 = arith.constant 0 : index
    %6 = vector.load %arg7[%c0_6, %c2, %c0_7] : memref<1x32x128xbf16, #tpu.memory_space<vmem>>, vector<1x16x128xbf16>
    tpu.vector_store %arg7[%c0_6, %c2, %c0_7], %5 {strides = array<i32>} : memref<1x32x128xbf16, #tpu.memory_space<vmem>>, vector<1x16x128xbf16>,
    %c0_8 = arith.constant 0 : index
    %c0_9 = arith.constant 0 : index
    %c0_10 = arith.constant 0 : index
    %7 = vector.load %arg2[%c0_8, %c0_9, %c0_10] : memref<5x128x128xbf16, #tpu.memory_space<vmem>>, vector<5x128x128xbf16>
    %8 = vector.shape_cast %7 : vector<5x128x128xbf16> to vector<640x128xbf16>
    %c0_11 = arith.constant 0 : index
    %c0_12 = arith.constant 0 : index
    %c0_13 = arith.constant 0 : index
    %9 = vector.load %arg4[%c0_11, %c0_12, %c0_13] : memref<5x128x128xbf16, #tpu.memory_space<vmem>>, vector<5x128x128xbf16>
    %10 = vector.shape_cast %9 : vector<5x128x128xbf16> to vector<640x128xbf16>
    %c0_14 = arith.constant 0 : index
    %c0_15 = arith.constant 0 : index
    %c0_16 = arith.constant 0 : index
    %11 = vector.load %arg7[%c0_14, %c0_15, %c0_16] : memref<1x32x128xbf16, #tpu.memory_space<vmem>>, vector<1x16x128xbf16>
    %12 = vector.shape_cast %11 : vector<1x16x128xbf16> to vector<16x128xbf16>
    %c0_17 = arith.constant 0 : index
    %c0_18 = arith.constant 0 : index
    %13 = vector.load %arg8[%c0_17, %c0_18] : memref<16x640xbf16, #tpu.memory_space<vmem>>, vector<16x128xbf16>
    tpu.vector_store %arg8[%c0_17, %c0_18], %12 {strides = array<i32>} : memref<16x640xbf16, #tpu.memory_space<vmem>>, vector<16x128xbf16>,
    %c0_19 = arith.constant 0 : index
    %c1 = arith.constant 1 : index
    %c0_20 = arith.constant 0 : index
    %14 = vector.load %arg7[%c0_19, %c1, %c0_20] : memref<1x32x128xbf16, #tpu.memory_space<vmem>>, vector<1x16x128xbf16>
    %15 = vector.shape_cast %14 : vector<1x16x128xbf16> to vector<16x128xbf16>
    %c0_21 = arith.constant 0 : index
    %c128 = arith.constant 128 : index
    %16 = vector.load %arg8[%c0_21, %c128] : memref<16x640xbf16, #tpu.memory_space<vmem>>, vector<16x128xbf16>
    tpu.vector_store %arg8[%c0_21, %c128], %15 {strides = array<i32>} : memref<16x640xbf16, #tpu.memory_space<vmem>>, vector<16x128xbf16>,
    %c0_22 = arith.constant 0 : index
    %c2_23 = arith.constant 2 : index
    %c0_24 = arith.constant 0 : index
    %17 = vector.load %arg7[%c0_22, %c2_23, %c0_24] : memref<1x32x128xbf16, #tpu.memory_space<vmem>>, vector<1x16x128xbf16>
    %18 = vector.shape_cast %17 : vector<1x16x128xbf16> to vector<16x128xbf16>
    %c0_25 = arith.constant 0 : index
    %c256 = arith.constant 256 : index
    %19 = vector.load %arg8[%c0_25, %c256] : memref<16x640xbf16, #tpu.memory_space<vmem>>, vector<16x128xbf16>
    tpu.vector_store %arg8[%c0_25, %c256], %18 {strides = array<i32>} : memref<16x640xbf16, #tpu.memory_space<vmem>>, vector<16x128xbf16>,
    %c0_26 = arith.constant 0 : index
    %c3 = arith.constant 3 : index
    %c0_27 = arith.constant 0 : index
    %20 = vector.load %arg7[%c0_26, %c3, %c0_27] : memref<1x32x128xbf16, #tpu.memory_space<vmem>>, vector<1x16x128xbf16>
    %21 = vector.shape_cast %20 : vector<1x16x128xbf16> to vector<16x128xbf16>
    %c0_28 = arith.constant 0 : index
    %c384 = arith.constant 384 : index
    %22 = vector.load %arg8[%c0_28, %c384] : memref<16x640xbf16, #tpu.memory_space<vmem>>, vector<16x128xbf16>
    tpu.vector_store %arg8[%c0_28, %c384], %21 {strides = array<i32>} : memref<16x640xbf16, #tpu.memory_space<vmem>>, vector<16x128xbf16>,
    %c0_29 = arith.constant 0 : index
    %c4 = arith.constant 4 : index
    %c0_30 = arith.constant 0 : index
    %23 = vector.load %arg7[%c0_29, %c4, %c0_30] : memref<1x32x128xbf16, #tpu.memory_space<vmem>>, vector<1x16x128xbf16>
    %24 = vector.shape_cast %23 : vector<1x16x128xbf16> to vector<16x128xbf16>
    %c0_31 = arith.constant 0 : index
    %c512 = arith.constant 512 : index
    %25 = vector.load %arg8[%c0_31, %c512] : memref<16x640xbf16, #tpu.memory_space<vmem>>, vector<16x128xbf16>
    tpu.vector_store %arg8[%c0_31, %c512], %24 {strides = array<i32>} : memref<16x640xbf16, #tpu.memory_space<vmem>>, vector<16x128xbf16>,
    %c0_32 = arith.constant 0 : index
    %c0_33 = arith.constant 0 : index
    %26 = vector.load %arg8[%c0_32, %c0_33] : memref<16x640xbf16, #tpu.memory_space<vmem>>, vector<16x640xbf16>
    %cst_34 = arith.constant dense<0.000000e+00> : vector<16x128xf32>
    %27 = tpu.matmul %26, %8, %cst_34 {dimension_numbers = #tpu.dot_dimension_numbers<[1], [0], [0], [1], [0, 0, 1, 1], [], []>} : vector<16x640xbf16>, vector<640x128xbf16>, vector<16x128xf32> -> vector<16x128xf32>
    %c0_35 = arith.constant 0 : index
    %c0_36 = arith.constant 0 : index
    %28 = vector.load %arg3[%c0_35, %c0_36] : memref<1x128xf32, #tpu.memory_space<vmem>>, vector<1x128xf32>
    %29 = vector.broadcast %28 : vector<1x128xf32> to vector<16x128xf32>
    %30 = arith.addf %27, %29 : vector<16x128xf32>
    %cst_37 = arith.constant 0.000000e+00 : f32
    %31 = vector.broadcast %cst_37 : f32 to vector<16x128xf32>
    %32 = arith.cmpf oge, %30, %31 : vector<16x128xf32>
    %cst_38 = arith.constant 2.000000e-01 : f32
    %33 = vector.broadcast %cst_38 : f32 to vector<16x128xf32>
    %34 = arith.mulf %33, %30 : vector<16x128xf32>
    %35 = arith.select %32, %30, %34 : vector<16x128xi1>, vector<16x128xf32>
    %36 = arith.truncf %35 : vector<16x128xf32> to vector<16x128xbf16>
    %37 = vector.shape_cast %36 : vector<16x128xbf16> to vector<1x16x128xbf16>
    %c0_39 = arith.constant 0 : index
    %c2_40 = arith.constant 2 : index
    %c0_41 = arith.constant 0 : index
    %38 = vector.load %arg7[%c0_39, %c2_40, %c0_41] : memref<1x32x128xbf16, #tpu.memory_space<vmem>>, vector<1x16x128xbf16>
    tpu.vector_store %arg7[%c0_39, %c2_40, %c0_41], %37 {strides = array<i32>} : memref<1x32x128xbf16, #tpu.memory_space<vmem>>, vector<1x16x128xbf16>,
    %c0_42 = arith.constant 0 : index
    %c0_43 = arith.constant 0 : index
    %c0_44 = arith.constant 0 : index
    %39 = vector.load %arg7[%c0_42, %c0_43, %c0_44] : memref<1x32x128xbf16, #tpu.memory_space<vmem>>, vector<1x16x128xbf16>
    %40 = vector.shape_cast %39 : vector<1x16x128xbf16> to vector<16x128xbf16>
    %c0_45 = arith.constant 0 : index
    %c0_46 = arith.constant 0 : index
    %41 = vector.load %arg8[%c0_45, %c0_46] : memref<16x640xbf16, #tpu.memory_space<vmem>>, vector<16x128xbf16>
    tpu.vector_store %arg8[%c0_45, %c0_46], %40 {strides = array<i32>} : memref<16x640xbf16, #tpu.memory_space<vmem>>, vector<16x128xbf16>,
    %c0_47 = arith.constant 0 : index
    %c1_48 = arith.constant 1 : index
    %c0_49 = arith.constant 0 : index
    %42 = vector.load %arg7[%c0_47, %c1_48, %c0_49] : memref<1x32x128xbf16, #tpu.memory_space<vmem>>, vector<1x16x128xbf16>
    %43 = vector.shape_cast %42 : vector<1x16x128xbf16> to vector<16x128xbf16>
    %c0_50 = arith.constant 0 : index
    %c128_51 = arith.constant 128 : index
    %44 = vector.load %arg8[%c0_50, %c128_51] : memref<16x640xbf16, #tpu.memory_space<vmem>>, vector<16x128xbf16>
    tpu.vector_store %arg8[%c0_50, %c128_51], %43 {strides = array<i32>} : memref<16x640xbf16, #tpu.memory_space<vmem>>, vector<16x128xbf16>,
    %c0_52 = arith.constant 0 : index
    %c2_53 = arith.constant 2 : index
    %c0_54 = arith.constant 0 : index
    %45 = vector.load %arg7[%c0_52, %c2_53, %c0_54] : memref<1x32x128xbf16, #tpu.memory_space<vmem>>, vector<1x16x128xbf16>
    %46 = vector.shape_cast %45 : vector<1x16x128xbf16> to vector<16x128xbf16>
    %c0_55 = arith.constant 0 : index
    %c256_56 = arith.constant 256 : index
    %47 = vector.load %arg8[%c0_55, %c256_56] : memref<16x640xbf16, #tpu.memory_space<vmem>>, vector<16x128xbf16>
    tpu.vector_store %arg8[%c0_55, %c256_56], %46 {strides = array<i32>} : memref<16x640xbf16, #tpu.memory_space<vmem>>, vector<16x128xbf16>,
    %c0_57 = arith.constant 0 : index
    %c3_58 = arith.constant 3 : index
    %c0_59 = arith.constant 0 : index
    %48 = vector.load %arg7[%c0_57, %c3_58, %c0_59] : memref<1x32x128xbf16, #tpu.memory_space<vmem>>, vector<1x16x128xbf16>
    %49 = vector.shape_cast %48 : vector<1x16x128xbf16> to vector<16x128xbf16>
    %c0_60 = arith.constant 0 : index
    %c384_61 = arith.constant 384 : index
    %50 = vector.load %arg8[%c0_60, %c384_61] : memref<16x640xbf16, #tpu.memory_space<vmem>>, vector<16x128xbf16>
    tpu.vector_store %arg8[%c0_60, %c384_61], %49 {strides = array<i32>} : memref<16x640xbf16, #tpu.memory_space<vmem>>, vector<16x128xbf16>,
    %c0_62 = arith.constant 0 : index
    %c4_63 = arith.constant 4 : index
    %c0_64 = arith.constant 0 : index
    %51 = vector.load %arg7[%c0_62, %c4_63, %c0_64] : memref<1x32x128xbf16, #tpu.memory_space<vmem>>, vector<1x16x128xbf16>
    %52 = vector.shape_cast %51 : vector<1x16x128xbf16> to vector<16x128xbf16>
    %c0_65 = arith.constant 0 : index
    %c512_66 = arith.constant 512 : index
    %53 = vector.load %arg8[%c0_65, %c512_66] : memref<16x640xbf16, #tpu.memory_space<vmem>>, vector<16x128xbf16>
    tpu.vector_store %arg8[%c0_65, %c512_66], %52 {strides = array<i32>} : memref<16x640xbf16, #tpu.memory_space<vmem>>, vector<16x128xbf16>,
    %c0_67 = arith.constant 0 : index
    %c0_68 = arith.constant 0 : index
    %54 = vector.load %arg8[%c0_67, %c0_68] : memref<16x640xbf16, #tpu.memory_space<vmem>>, vector<16x640xbf16>
    %cst_69 = arith.constant dense<0.000000e+00> : vector<16x128xf32>
    %55 = tpu.matmul %54, %10, %cst_69 {dimension_numbers = #tpu.dot_dimension_numbers<[1], [0], [0], [1], [0, 0, 1, 1], [], []>} : vector<16x640xbf16>, vector<640x128xbf16>, vector<16x128xf32> -> vector<16x128xf32>
    %c0_70 = arith.constant 0 : index
    %c0_71 = arith.constant 0 : index
    %56 = vector.load %arg1[%c0_70, %c0_71] : memref<16x128xf32, #tpu.memory_space<vmem>>, vector<16x128xf32>
    %57 = arith.addf %56, %55 : vector<16x128xf32>
    %c0_72 = arith.constant 0 : index
    %c0_73 = arith.constant 0 : index
    %58 = vector.load %arg5[%c0_72, %c0_73] : memref<1x128xf32, #tpu.memory_space<vmem>>, vector<1x128xf32>
    %59 = vector.broadcast %58 : vector<1x128xf32> to vector<16x128xf32>
    %60 = arith.addf %57, %59 : vector<16x128xf32>
    %c0_74 = arith.constant 0 : index
    %c0_75 = arith.constant 0 : index
    %61 = vector.load %arg6[%c0_74, %c0_75] : memref<16x128xf32, #tpu.memory_space<vmem>>, vector<16x128xf32>
    tpu.vector_store %arg6[%c0_74, %c0_75], %60 {strides = array<i32>} : memref<16x128xf32, #tpu.memory_space<vmem>>, vector<16x128xf32>,
    return
  }
  func.func @transform_0(%arg0: i32) -> (i32, i32) {
    %c0_i32 = arith.constant 0 : i32
    %c0_i32_0 = arith.constant 0 : i32
    return %arg0, %c0_i32 : i32, i32
  }
  func.func @transform_1(%arg0: i32) -> (i32, i32, i32) {
    %c0_i32 = arith.constant 0 : i32
    %c0_i32_0 = arith.constant 0 : i32
    %c0_i32_1 = arith.constant 0 : i32
    %c0_i32_2 = arith.constant 0 : i32
    return %c0_i32, %c0_i32_0, %c0_i32_1 : i32, i32, i32
  }
  func.func @transform_2(%arg0: i32) -> (i32, i32) {
    %c0_i32 = arith.constant 0 : i32
    %c0_i32_0 = arith.constant 0 : i32
    %c0_i32_1 = arith.constant 0 : i32
    return %c0_i32, %c0_i32_0 : i32, i32
  }
  func.func @transform_3(%arg0: i32) -> (i32, i32, i32) {
    %c0_i32 = arith.constant 0 : i32
    %c0_i32_0 = arith.constant 0 : i32
    %c0_i32_1 = arith.constant 0 : i32
    %c0_i32_2 = arith.constant 0 : i32
    return %c0_i32, %c0_i32_0, %c0_i32_1 : i32, i32, i32
  }
  func.func @transform_4(%arg0: i32) -> (i32, i32) {
    %c0_i32 = arith.constant 0 : i32
    %c0_i32_0 = arith.constant 0 : i32
    %c0_i32_1 = arith.constant 0 : i32
    return %c0_i32, %c0_i32_0 : i32, i32
  }
  func.func @transform_5(%arg0: i32) -> (i32, i32) {
    %c0_i32 = arith.constant 0 : i32
    %c0_i32_0 = arith.constant 0 : i32
    return %arg0, %c0_i32 : i32, i32
  }
}

</mosaic_0001>

<bundles_post_ra>
// kernel: scyclone_d_block_ntc.1
= control target key start
LH: loop header
LB: loop body
LE: loop exit
PB: predicated region body
PF: predicated region fallthrough
CT: control target
= control target key end

     0   :  { %10 = vsyncpa [#allocation5], 0  ;;  %s2549_s0 = inlined_call_operand.hbm [shape: f32[32,128], index: 0, kind: input, shape index: {}]   ;;  %s2550_s1 = inlined_call_operand.hbm [shape: bf16[5,128,128], index: 1, kind: input, shape index: {}]   ;;  %s2551_s2 = inlined_call_operand.vmem [shape: f32[1,128], index: 2, kind: input, shape index: {}]   ;;  %s2552_s3 = inlined_call_operand.hbm [shape: bf16[5,128,128], index: 3, kind: input, shape index: {}]   ;;  %s2553_s4 = inlined_call_operand.vmem [shape: f32[1,128], index: 4, kind: input, shape index: {}]   ;;  %s2554_s5 = inlined_call_operand.hbm [shape: f32[32,128], index: 5, kind: output, shape index: {}]  }
   0x1   :  { %12 = vsyncpa [#allocation5 + $0x1], 0 }
   0x2   :  { %13 = vsyncpa [#allocation8], 0 }
   0x3   :  { %14 = vsyncpa [#allocation6], 0 }
   0x4   :  { %16 = vsyncpa [#allocation6 + $0x1], 0  ;;  %s2253_s18 = smov 0   ;;  %s2255_s19 = smov 0  }
   0x5   :  { %s2257_s20 = smov 0   ;;  %s2259_s21 = smov 0  }
   0x6 LB: > { %s2274_s22 = sadd.s32 4294967295, %s2208_s21   ;;  %s1620_s23 = sadd.s32 4294967294, %s2208_s21   ;;  %s2208_s21 = sphi %s2259_s21, %s2586_s21   ;;  %s2204_s20 = sphi %s2257_s20, %s2585_s20   ;;  %s2200_s19 = sphi %s2255_s19, %s2584_s19   ;;  %s2196_s18 = sphi %s2253_s18, %s2583_s18  }
   0x7   : > { %p42_p0 = scmp.ne.s32.totalorder %s2200_s19, %s2196_s18  ;;  %p2555_p1 = scmp.eq.s32.totalorder %s2274_s22, 0 }
   0x8   : > { %p156_p3 = scmp.eq.s32.totalorder %s1620_s23, 1  ;;  %p1621_p5 = scmp.ge.s32.totalorder %s2208_s21, 1 }
   0x9   : > { %p2283_p4 = por %p2555_p1, %p42_p0  ;;  %p163_p7 = scmp.lt.s32.totalorder %s2208_s21, 3 }
   0xa   : > { %p2288_p6 = por %p156_p3, %p42_p0  ;;  %s2210_s27 = smov [#allocation7]  }
   0xb   : > { %s2559_s24 = scalar_select %p2283_p4, 1, 0 }
   0xc   : > { %s2560_s25 = scalar_select %p2288_p6, 1, 0 }
   0xd   : > { %p2293_p8 = pnand %p1621_p5, %p163_p7  ;;  %s175_s28 = sshll.u32 %s2210_s27, 4  ;;  %s176_s28 = int_to_ptr.vmem [resolvable:$true] %s175_s28 }
   0xe   : > { %s2211_s30 = smov [#allocation9]   ;;  %s2071_s7 = scalar_lea.vmem %s176_s28, 5120 }
   0xf   : > { %s2561_s26 = scalar_select %p2293_p8, 1, 0 }
  0x10   : > { %p1902_p9 = pneg %p2293_p8  ;;  %s191_s6 = sshll.u32 %s2211_s30, 4  ;;  %s192_s6 = int_to_ptr.vmem [resolvable:$true] %s191_s6 }
  0x11   : > { %p2072_p13 = scmp.ne.s32.totalorder %s176_s28, %s2071_s7  ;;  %p2079_p5 = scmp.lt.s32.totalorder %s176_s28, %s176_s28 }
  0x12   : > { %p2302_p11 = pnand %p1902_p9, %p2555_p1  ;;  %p2080_p7 = scmp.lt.s32.totalorder %s2071_s7, %s2071_s7 }
  0x14   : > { %p2062_p12 = pneg %p2302_p11  ;;  %p2081_p10 = por %p2080_p7, %p2079_p5 }
  0x16   : > { %p2074_p0 = pnand %p2072_p13, %p2062_p12 }
  0x18   : > { %p2075_p3 = pneg %p2074_p0 }
  0x1a   : > { %p2082_p9 = pnand %p2081_p10, %p2075_p3 }
  0x1c   : > { %2085 = shalt.err (!%p2082_p9)
}
  0x1d   : > { %s2212_s8 = smov 64   ;;  %s2213_s9 = smov 4  }
  0x1e   : > { %1905 = dma.hbm_to_vmem [thread:$0]  (!%p2302_p11), %s2550_s1, 5120, %s176_s28, [#allocation8], %s2212_s8, %s2212_s8, %s2213_s9  }
  0x1f   : > { %s2097_s12 = scalar_lea.vmem %s192_s6, 5120  ;;  %p2105_p2 = scmp.lt.s32.totalorder %s192_s6, %s192_s6 }
  0x20   : > { %p2098_p1 = scmp.ne.s32.totalorder %s192_s6, %s2097_s12  ;;  %p2106_p6 = scmp.lt.s32.totalorder %s2097_s12, %s2097_s12 }
  0x22   : > { %p2100_p13 = pnand %p2098_p1, %p2062_p12  ;;  %p2107_p5 = por %p2106_p6, %p2105_p2 }
  0x24   : > { %p2101_p0 = pneg %p2100_p13 }
  0x26   : > { %p2108_p10 = pnand %p2107_p5, %p2101_p0 }
  0x28   : > { %2111 = shalt.err (!%p2108_p10)
}
  0x29   : > { %1908 = dma.hbm_to_vmem [thread:$0]  (!%p2302_p11), %s2552_s3, 5120, %s192_s6, [#allocation8], %s2212_s8, %s2212_s8, %s2213_s9  }
  0x2a   : > { %s2325_s15 = sadd.s32 1, %s2208_s21   ;;  %s29_s16 = sadd.s32 1, %s2204_s20 }
  0x2b   : > { %s26_s17 = ssub.s32 %s2208_s21, %s2325_s15  ;;  %p36_p1 = scmp.ne.s32.totalorder %s2204_s20, %s2200_s19 }
  0x2c   : > { %p27_p2 = scmp.eq.s32.totalorder %s26_s17, 0  ;;  %p37_p6 = scmp.eq.s32.totalorder %s2208_s21, 0 }
  0x2d   : > { %p2563_p12 = scmp.eq.s32.totalorder %s2274_s22, 1  ;;  %p1919_p7 = scmp.lt.s32.totalorder %s2208_s21, 2 }
  0x2e   : > { %s2341_s27 = scalar_select %p27_p2, %s2204_s20, %s29_s16  }
  0x2f   : > { %p2335_p3 = por %p2563_p12, %p36_p1  ;;  %p38_p9 = por %p37_p6, %p36_p1 }
  0x30   : > { %s208_s28 = sand.u32 1, %s2204_s20   ;;  %s1738_s30 = sshll.u32 %s2208_s21, 8 }
  0x31   : > { %s2564_s23 = scalar_select %p2335_p3, 1, 0 }
  0x32   : > { %s1625_s29 = sshll.u32 %s208_s28, 4  ;;  %s2348_s8 = scalar_lea.hbm %s2549_s0, %s1738_s30 }
  0x33   : > { %s212_s9 = scalar_lea.vmem [#allocation4], %s1625_s29  ;;  %p2352_p11 = pnand %p1919_p7, %p38_p9 }
  0x34   : > { %s219_s10 = sshll.u32 %s212_s9, 4  ;;  %s2356_s12 = scalar_lea.sflag [#allocation5], %s208_s28  ;;  %s2350_s10 = int_to_ptr.vmem [resolvable:$true] %s219_s10 }
  0x35   : > { %s2112_s13 = scalar_lea.hbm %s2348_s8, 256  ;;  %p2114_p0 = pneg %p2352_p11 }
  0x36   : > { %p2113_p13 = scmp.ne.s32.totalorder %s2348_s8, %s2112_s13  ;;  %s2117_s17 = scalar_lea.hbm %s2549_s0, 512 }
  0x37   : > { %p2118_p1 = scmp.lt.s32.totalorder %s2348_s8, %s2549_s0  ;;  %p2119_p2 = scmp.lt.s32.totalorder %s2117_s17, %s2112_s13 }
  0x38   : > { %p2115_p5 = pnand %p2114_p0, %p2113_p13 }
  0x39   : > { %p2120_p6 = por %p2119_p2, %p2118_p1 }
  0x3a   : > { %p2116_p10 = pneg %p2115_p5 }
  0x3c   : > { %p2121_p12 = pnand %p2120_p6, %p2116_p10 }
  0x3e   : > { %2124 = shalt.err (!%p2121_p12)
}
  0x3f   : > { %s2125_s28 = scalar_lea.vmem %s2350_s10, 256  ;;  %s2214_s6 = smov [#allocation4]  }
  0x40   : > { %p2126_p7 = scmp.ne.s32.totalorder %s2350_s10, %s2125_s28  ;;  %s2130_s7 = sshll.u32 %s2214_s6, 4  ;;  %s2131_s7 = int_to_ptr.vmem [resolvable:$false] %s2130_s7 }
  0x41   : > { %s2132_s9 = scalar_lea.vmem %s2131_s7, 512  ;;  %p2133_p5 = scmp.lt.s32.totalorder %s2350_s10, %s2131_s7 }
  0x42   : > { %p2128_p9 = pnand %p2126_p7, %p2114_p0  ;;  %p2134_p3 = scmp.lt.s32.totalorder %s2132_s9, %s2125_s28 }
  0x44   : > { %p2129_p13 = pneg %p2128_p9  ;;  %p2135_p4 = por %p2134_p3, %p2133_p5 }
  0x46   : > { %p2136_p8 = pnand %p2135_p4, %p2129_p13 }
  0x48   : > { %2139 = shalt.err (!%p2136_p8)
}
  0x49   : > { %s2215_s13 = smov 128   ;;  %s2216_s14 = smov 8  }
  0x4a   : > { %1912 = dma.hbm_to_vmem [thread:$0]  (!%p2352_p11), %s2348_s8, 256, %s2350_s10, %s2356_s12, %s2215_s13, %s2215_s13, %s2216_s14  }
  0x4b   : > { %p2566_p0 = scmp.ne.s32.totalorder %s2561_s26, 0 }
  0x4c   : > { %s2380_s16 = sand.u32 (!%p2566_p0), 1, %s2200_s19   ;;  %p2567_p4 = scmp.ne.s32.totalorder (!%p2566_p0), %s2559_s24, 0 }
  0x4d   : > { %231 = sbr.rel (%p2566_p0) target bundleno = 648 (0x288), region = 40  ;;  %s1629_s17 = sshll.u32 (!%p2566_p0), %s2380_s16, 4 }
  0x4e   : > { %s234_s29 = scalar_lea.sflag (!%p2566_p0), [#allocation5], %s2380_s16  ;;  %s2386_s30 = scalar_lea.vmem (!%p2566_p0), [#allocation4], %s1629_s17 }
  0x52   : > { %2183 = dma.done.wait (%p2567_p4), %s234_s29, 256  }
  0x53   : > { %2185 = vsyncadd (%p2567_p4), %s234_s29, 4294967040  ;;  %p2568_p8 = scmp.eq.s32.totalorder %s2274_s22, 0 }
  0x55   : > { %2187 = dma.done.wait (%p2568_p8), [#allocation8], 10240   ;;  %p2569_p3 = pmov %p2568_p8 }
  0x56   : > { %v2217_v0 = vmov 0   ;;  %v1966_v1 = vld [vmem:[#allocation7 + $0x78] sm:$0xff]   ;;  %v1969_v4 = vld [vmem:[#allocation7 + $0x70] sm:$0xff]   ;;  %v1973_v8 = vld [vmem:[#allocation7 + $0x68] sm:$0xff]   ;;  %vm285_vm0 = vcmask 1040384   ;;  %vm286_vm1 = vcmask 1044484  }
  0x57   : > { %2189 = vsyncadd (%p2569_p3), [#allocation8], 4294957056  ;;  %275 = vst [vmem:[#allocation2] sm:$0x1] %v2217_v0  ;;  %v1967_v2 = vld [vmem:[#allocation7 + $0x38] sm:$0xff]   ;;  %1744 = vmatprep.subr.bf16.mxu0 %v1966_v1  ;;  %v1971_v6 = vld [vmem:[#allocation7 + $0x30] sm:$0xff]  }
  0x58   : > { %276 = vst [vmem:[#allocation2 + $0x8] sm:$0x2] %v2217_v0  ;;  %v1968_v3 = vld [vmem:[#allocation7 + $0xf8] sm:$0xff]   ;;  %1745 = vmatpush3.bf16.msra.mxu0 %v1967_v2  ;;  %v1972_v7 = vld [vmem:[#allocation7 + $0xf0] sm:$0xff]   ;;  %v1975_v10 = vld [vmem:[#allocation7 + $0x28] sm:$0xff]   ;;  %v2218_v37 = vmov 0.0  }
  0x59   : > { %1766 = vmatprep.subr.bf16.mxu1 %v1968_v3  ;;  %v1970_v5 = vld [vmem:[#allocation7 + $0xb8] sm:$0xff]   ;;  %1746 = vmatprep.subr.bf16.mxu0 %v1969_v4  ;;  %v1974_v9 = vld [vmem:[#allocation7 + $0xb0] sm:$0xff]   ;;  %v1976_v11 = vld [vmem:[#allocation7 + $0xe8] sm:$0xff]   ;;  %vm466_vm3 = vsmask.f32 3328  ;;  %vm503_vm5 = vcmask 1042432  }
  0x5a   : > { %1767 = vmatpush3.bf16.msra.mxu1 %v1970_v5  ;;  %v1977_v12 = vld [vmem:[#allocation7 + $0x60] sm:$0xff]   ;;  %v1978_v13 = vld [vmem:[#allocation7 + $0xa8] sm:$0xff]   ;;  %v1981_v16 = vld [vmem:[#allocation7 + $0x58] sm:$0xff]   ;;  %vm467_vm4 = vsmask.f32 7440  ;;  %vm504_vm6 = vcmask 1046532  }
  0x5b   : > { %1768 = vmatprep.subr.bf16.mxu1 %v1972_v7  ;;  %v1979_v14 = vld [vmem:[#allocation7 + $0x20] sm:$0xff]   ;;  %v1983_v18 = vld [vmem:[#allocation7 + $0x18] sm:$0xff]   ;;  %v1985_v20 = vld [vmem:[#allocation7 + $0x50] sm:$0xff]   ;;  %vm561_vm7 = vcmask 1041408   ;;  %vm520_vm8 = vsmask.f32 2304 }
  0x5c   : > { %1747 = vmatpush3.bf16.msra.mxu0 %v1971_v6  ;;  %v1980_v15 = vld [vmem:[#allocation7 + $0xe0] sm:$0xff]   ;;  %v1984_v19 = vld [vmem:[#allocation7 + $0xd8] sm:$0xff]   ;;  %v1987_v22 = vld [vmem:[#allocation7 + $0x10] sm:$0xff]   ;;  %vm521_vm9 = vsmask.f32 6416  ;;  %vm562_vm10 = vcmask 1045508  }
  0x5d   : > { %1748 = vmatprep.subr.bf16.mxu0 %v1973_v8  ;;  %v1982_v17 = vld [vmem:[#allocation7 + $0xa0] sm:$0xff]   ;;  %v1986_v21 = vld [vmem:[#allocation7 + $0x98] sm:$0xff]   ;;  %v1988_v23 = vld [vmem:[#allocation7 + $0xd0] sm:$0xff]   ;;  %vm2219_vm15 = vmmov 0   ;;  %s271_s11 = scalar_lea.vmem [#allocation10], %s1629_s17  ;;  %s1743_s28 = sshll.u32 %s2274_s22, 8 }
  0x5e   : > { %1769 = vmatpush3.bf16.msra.mxu1 %v1974_v9  ;;  %v1989_v24 = vld [vmem:[#allocation7 + $0x48] sm:$0xff]   ;;  %v1990_v25 = vld [vmem:[#allocation7 + $0x90] sm:$0xff]   ;;  %v1993_v28 = vld [vmem:[#allocation7 + $0x40] sm:$0xff]   ;;  %s1528_s12 = sshll.u32 %s271_s11, 4  ;;  %s2506_s9 = scalar_lea.hbm %s2554_s5, %s1743_s28  ;;  %s2500_s12 = int_to_ptr.vmem [resolvable:$true] %s1528_s12 }
  0x5f   : > { %1770 = vmatprep.subr.bf16.mxu1 %v1976_v11  ;;  %v1991_v26 = vld [vmem:[#allocation7 + $0x8] sm:$0xff]   ;;  %v1995_v30 = vld [vmem:[#allocation7] sm:$0xff]   ;;  %vm2407_vm2 = vmor %vm285_vm0, %vm286_vm1  ;;  %s1515_s13 = scalar_lea.sflag [#allocation6], %s2380_s16  ;;  %s2140_s14 = scalar_lea.vmem %s2500_s12, 256 }
  0x60   : > { %1749 = vmatpush3.bf16.msra.mxu0 %v1975_v10  ;;  %v1992_v27 = vld [vmem:[#allocation7 + $0xc8] sm:$0xff]   ;;  %v1996_v31 = vld [vmem:[#allocation7 + $0xc0] sm:$0xff]   ;;  %vm2415_vm11 = vmor %vm503_vm5, %vm504_vm6  ;;  %p2141_p11 = scmp.ne.s32.totalorder %s2500_s12, %s2140_s14  ;;  %p2580_p10 = scmp.ne.s32.totalorder %s2564_s23, 0 }
  0x61   : > { %1750 = vmatprep.subr.bf16.mxu0 %v1977_v12  ;;  %v1994_v29 = vld [vmem:[#allocation7 + $0x88] sm:$0xff]   ;;  %v2397_v32 = vld [vmem:[%s2386_s30] sm:$0xff]  ;;  %vm2421_vm12 = vmor %vm466_vm3, %vm467_vm4  ;;  %s2220_s22 = smov [#allocation10]  }
  0x62   : > { %1771 = vmatpush3.bf16.msra.mxu1 %v1978_v13  ;;  %v2400_v33 = vld [vmem:[%s2386_s30 + $0x8] sm:$0xff]  ;;  %v1739_v34 = vpack.c.bf16 %v2397_v32, %v2397_v32  ;;  %v1999_v36 = vld [vmem:[#allocation7 + $0x80] sm:$0xff]   ;;  %vm2433_vm13 = vmor %vm561_vm7, %vm562_vm10  ;;  %p2142_p1 = pnand %p2141_p11, %p2580_p10  ;;  %s2144_s17 = sshll.u32 %s2220_s22, 4  ;;  %s2145_s17 = int_to_ptr.vmem [resolvable:$false] %s2144_s17 }
  0x63   : > { %1772 = vmatprep.subr.bf16.mxu1 %v1980_v15  ;;  %v1740_v35 = vpack.c.bf16 %v2400_v33, %v2400_v33  ;;  %vm2439_vm14 = vmor %vm520_vm8, %vm521_vm9  ;;  %s2146_s29 = scalar_lea.vmem %s2145_s17, 512  ;;  %p2147_p6 = scmp.lt.s32.totalorder %s2500_s12, %s2145_s17 }
  0x64   : > { %1751 = vmatpush3.bf16.msra.mxu0 %v1979_v14  ;;  %v288_v39 = vrot.slane %v1739_v34, 7  ;;  %p2143_p2 = pneg %p2142_p1  ;;  %p2148_p12 = scmp.lt.s32.totalorder %s2146_s29, %s2140_s14 }
  0x65   : > { %1752 = vmatprep.subr.bf16.mxu0 %v1981_v16  ;;  %v290_v40 = vrot.slane %v1740_v35, 7 }
  0x66   : > { %1773 = vmatpush3.bf16.msra.mxu1 %v1982_v17  ;;  %v289_v41 = vrot.slane %v288_v39, 4  ;;  %296 = vst [vmem:[#allocation2] sm:$0xe] %v288_v39  ;;  %p2149_p7 = por %p2148_p12, %p2147_p6 }
  0x67   : > { %1774 = vmatprep.subr.bf16.mxu1 %v1984_v19  ;;  %v292_v42 = vrot.slane %v290_v40, 4 }
  0x68   : > { %1753 = vmatpush3.bf16.msra.mxu0 %v1983_v18  ;;  %v291_v43 = vsel %vm2407_vm2, %v289_v41, %v290_v40  ;;  %p2150_p9 = pnand %p2149_p7, %p2143_p2 }
  0x69   : > { %1754 = vmatprep.subr.bf16.mxu0 %v1985_v20  ;;  %298 = vst [vmem:[#allocation2 + $0x8] sm:$0x1] %v292_v42  ;;  %297 = vst [vmem:[#allocation2 + $0x4] sm:$0xf] %v291_v43 }
  0x6a   : > { %1775 = vmatpush3.bf16.msra.mxu1 %v1986_v21 }
  0x6b   : > { %1776 = vmatprep.subr.bf16.mxu1 %v1988_v23 }
  0x6c   : > { %1755 = vmatpush3.bf16.msra.mxu0 %v1987_v22 }
  0x6d   : > { %1756 = vmatprep.subr.bf16.mxu0 %v1989_v24  ;;  %v459_v44 = vld [vmem:[#allocation2] sm:$0xf] }
  0x6e   : > { %1777 = vmatpush3.bf16.msra.mxu1 %v1990_v25  ;;  %v463_v45 = vld [vmem:[#allocation2] sm:$0xf]  ;;  %461 = vst [vmem:[#allocation3] sm:$0xf] %v459_v44 }
  0x6f   : > { %1778 = vmatprep.subr.bf16.mxu1 %v1992_v27  ;;  %v497_v46 = vld [vmem:[#allocation2] sm:$0xe]  ;;  %v470_v47 = vshrl.u32 %v463_v45, 16  ;;  %v473_v48 = vshll.u32 %v463_v45, 16 }
  0x70   : > { %1757 = vmatpush3.bf16.msra.mxu0 %v1991_v26  ;;  %v1635_v49 = vrot.slane %v497_v46, 9  ;;  %v465_v50 = vld [vmem:[#allocation2 + $0x8] sm:$0x1]  ;;  %v517_v52 = vld [vmem:[#allocation2] sm:$0xe] }
  0x71   : > { %1758 = vmatprep.subr.bf16.mxu0 %v1993_v28  ;;  %v499_v51 = vld [vmem:[#allocation2 + $0x8] sm:$0x1]  ;;  %v460_v53 = vld [vmem:[#allocation2 + $0x4] sm:$0xf]  ;;  %v472_v55 = vrot.slane %v470_v47, 4  ;;  %v475_v56 = vrot.slane %v473_v48, 5 }
  0x72   : > { %1779 = vmatpush3.bf16.msra.mxu1 %v1994_v29  ;;  %v464_v54 = vld [vmem:[#allocation2 + $0x4] sm:$0xf]  ;;  %462 = vst [vmem:[#allocation3 + $0x14] sm:$0xf] %v460_v53  ;;  %v489_v59 = vshll.u32 %v465_v50, 16  ;;  %v511_v62 = vrot.slane %v499_v51, 5 }
  0x73   : > { %1780 = vmatprep.subr.bf16.mxu1 %v1996_v31  ;;  %v479_v57 = vshll.u32 %v464_v54, 16  ;;  %v483_v58 = vshrl.u32 %v464_v54, 16  ;;  %v498_v60 = vld [vmem:[#allocation2 + $0x4] sm:$0xf]  ;;  %v519_v63 = vld [vmem:[#allocation2 + $0x8] sm:$0x3]  ;;  %v476_v0 = vor.u32 %v475_v56, %v472_v55 }
  0x74   : > { %1759 = vmatpush3.bf16.msra.mxu0 %v1995_v30  ;;  %v508_v1 = vrot.slane %v498_v60, 5  ;;  %v518_v2 = vld [vmem:[#allocation2 + $0x4] sm:$0xf]  ;;  %v524_v3 = vshrl.u32 %v517_v52, 16  ;;  %v527_v4 = vshll.u32 %v517_v52, 16  ;;  %v491_v8 = vrot.slane %v489_v59, 5 }
  0x75   : > { %1850 = vmatprep.subr.bf16.mxu0 %v2218_v37  ;;  %v481_v6 = vrot.slane %v479_v57, 5  ;;  %v485_v7 = vrot.slane %v483_v58, 4  ;;  %v533_v9 = vshrl.u32 %v518_v2, 16  ;;  %v555_v10 = vld [vmem:[#allocation2] sm:$0xc]  ;;  %v477_v11 = vrot.slane %v476_v0, 4 }
  0x76   : > { %1781 = vmatpush3.bf16.msra.mxu1 %v1999_v36  ;;  %v509_v12 = vsel %vm2415_vm11, %v1635_v49, %v508_v1  ;;  %v510_v13 = vrot.slane %v508_v1, 4  ;;  %v526_v14 = vrot.slane %v524_v3, 5  ;;  %v556_v15 = vld [vmem:[#allocation2 + $0x4] sm:$0xf]  ;;  %v529_v17 = vrot.slane %v527_v4, 6  ;;  %v2001_v49 = vld [vmem:[#allocation7 + $0x138] sm:$0xff]  }
  0x77   : > { %v486_v16 = vor.u32 %v485_v7, %v481_v6  ;;  %515 = vst [vmem:[#allocation3 + $0x8] sm:$0xf] %v509_v12  ;;  %v535_v18 = vrot.slane %v533_v9, 5  ;;  %v536_v19 = vshll.u32 %v518_v2, 16  ;;  %v557_v20 = vld [vmem:[#allocation2 + $0x8] sm:$0x3]  ;;  %v482_v21 = vsel %vm2421_vm12, %v477_v11, %v481_v6 }
  0x78   : > { %v512_v22 = vsel %vm2415_vm11, %v510_v13, %v511_v62  ;;  %v543_v23 = vshrl.u32 %v519_v63, 16  ;;  %v546_v24 = vshll.u32 %v519_v63, 16  ;;  %495 = vst [vmem:[#allocation3 + $0x4] sm:$0xf] %v482_v21  ;;  %v530_v26 = vor.u32 %v529_v17, %v526_v14  ;;  %v2005_v52 = vld [vmem:[#allocation7 + $0x130] sm:$0xff]   ;;  %v2006_v55 = vld [vmem:[#allocation7 + $0x128] sm:$0xff]  }
  0x79   : > { %v487_v25 = vrot.slane %v486_v16, 4  ;;  %516 = vst [vmem:[#allocation3 + $0x1c] sm:$0xf] %v512_v22  ;;  %v538_v27 = vrot.slane %v536_v19, 6  ;;  %v1636_v29 = vrot.slane %v555_v10, 10  ;;  %v566_v35 = vrot.slane %v556_v15, 6 }
  0x7a   : > { %v545_v31 = vrot.slane %v543_v23, 5  ;;  %v548_v34 = vrot.slane %v546_v24, 6  ;;  %v569_v36 = vrot.slane %v557_v20, 6  ;;  %v531_v40 = vrot.slane %v530_v26, 4  ;;  %v2000_v51 = vld [vmem:[#allocation3] ss:$20 sps:$4 sm:$0xff]  }
  0x7b   : > { %v492_v39 = vsel %vm2421_vm12, %v487_v25, %v491_v8  ;;  %v539_v41 = vor.u32 %v538_v27, %v535_v18  ;;  %v567_v43 = vsel %vm2433_vm13, %v1636_v29, %v566_v35  ;;  %v568_v44 = vrot.slane %v566_v35, 4  ;;  %v2007_v56 = vld [vmem:[#allocation7 + $0x120] sm:$0xff]   ;;  %v2008_v57 = vld [vmem:[#allocation7 + $0x118] sm:$0xff]   ;;  %v2009_v58 = vld [vmem:[#allocation7 + $0x110] sm:$0xff]  }
  0x7c   : > { %496 = vst [vmem:[#allocation3 + $0x18] sm:$0xf] %v492_v39  ;;  %v549_v42 = vor.u32 %v548_v34, %v545_v31  ;;  %573 = vst [vmem:[#allocation3 + $0x10] sm:$0xf] %v567_v43  ;;  %v2010_v59 = vld [vmem:[#allocation7 + $0x108] sm:$0xff]   ;;  %v2011_v60 = vld [vmem:[#allocation7 + $0x100] sm:$0xff]  }
  0x7d   : > { %v540_v45 = vsel %vm2439_vm14, %v531_v40, %v539_v41  ;;  %v541_v46 = vrot.slane %v539_v41, 4  ;;  %v570_v47 = vsel %vm2433_vm13, %v568_v44, %v569_v36  ;;  %v2013_v63 = vld [vmem:[#allocation9 + $0x78] sm:$0xff]   ;;  %v2017_v3 = vld [vmem:[#allocation9 + $0x70] sm:$0xff]   ;;  %v2021_v8 = vld [vmem:[#allocation9 + $0x68] sm:$0xff]  }
  0x7e   : > { %553 = vst [vmem:[#allocation3 + $0xc] sm:$0xf] %v540_v45  ;;  %574 = vst [vmem:[#allocation3 + $0x24] sm:$0xf] %v570_v47  ;;  %v2014_v0 = vld [vmem:[#allocation9 + $0x38] sm:$0xff]   ;;  %1797 = vmatprep.subr.bf16.mxu1 %v2013_v63  ;;  %v2018_v4 = vld [vmem:[#allocation9 + $0x30] sm:$0xff]  }
  0x7f   : > { %v550_v48 = vsel %vm2439_vm14, %v541_v46, %v549_v42  ;;  %v2015_v1 = vld [vmem:[#allocation9 + $0xf8] sm:$0xff]   ;;  %v2019_v6 = vld [vmem:[#allocation9 + $0xf0] sm:$0xff]   ;;  %v2022_v9 = vld [vmem:[#allocation9 + $0x28] sm:$0xff]  }
  0x80   : > { %554 = vst [vmem:[#allocation3 + $0x20] sm:$0xf] %v550_v48  ;;  %v2004_v54 = vld [vmem:[#allocation3 + $0x8] ss:$20 sps:$4 sm:$0xff]   ;;  %v2016_v2 = vld [vmem:[#allocation9 + $0xb8] sm:$0xff]   ;;  %v2023_v10 = vld [vmem:[#allocation9 + $0xe8] sm:$0xff]  }
  0x81   : > { %v2020_v7 = vld [vmem:[#allocation9 + $0xb0] sm:$0xff]   ;;  %v2024_v11 = vld [vmem:[#allocation9 + $0xa8] sm:$0xff]   ;;  %v2025_v12 = vld [vmem:[#allocation9 + $0x60] sm:$0xff]  }
  0x82   : > { %v2027_v13 = vld [vmem:[#allocation9 + $0xe0] sm:$0xff]   ;;  %v2029_v16 = vld [vmem:[#allocation9 + $0x58] sm:$0xff]   ;;  %v2033_v20 = vld [vmem:[#allocation9 + $0x50] sm:$0xff]  }
  0x83   : > { %v1997_v50 = vld [vmem:[#allocation3 + $0x4] ss:$20 sps:$4 sm:$0xff]   ;;  %v2026_v14 = vld [vmem:[#allocation9 + $0x20] sm:$0xff]   ;;  %v2037_v24 = vld [vmem:[#allocation9 + $0x48] sm:$0xff]  }
  0x84   : > { %886 = vmatprep.mubr.bf16.mxu0 %v1997_v50  ;;  %v2028_v15 = vld [vmem:[#allocation9 + $0xa0] sm:$0xff]   ;;  %v2031_v17 = vld [vmem:[#allocation9 + $0xd8] sm:$0xff]   ;;  %v2035_v21 = vld [vmem:[#allocation9 + $0xd0] sm:$0xff]  }
  0x85   : > { %887 = vmatmul.mubr.bf16.vlgmr.msra.gmra.mxu0 %v2000_v51  ;;  %v2012_v62 = vld [vmem:[#allocation3 + $0x10] ss:$20 sps:$4 sm:$0xff]   ;;  %v2034_v22 = vld [vmem:[#allocation9 + $0x10] sm:$0xff]   ;;  %v2041_v29 = vld [vmem:[#allocation9 + $0x40] sm:$0xff]  }
  0x86   : > { %1851 = vmatpush3.bf16.msra.mxu0 %v2001_v49  ;;  %1866 = vmatprep.mubr.msk.bf16.mxu0 %vm2219_vm15, %v2218_v37  ;;  %v2030_v18 = vld [vmem:[#allocation9 + $0x18] sm:$0xff]   ;;  %v2036_v23 = vld [vmem:[#allocation9 + $0x90] sm:$0xff]   ;;  %v2039_v25 = vld [vmem:[#allocation9 + $0xc8] sm:$0xff]  }
  0x87   : > { %v2002_v53 = vld [vmem:[#allocation3 + $0xc] ss:$20 sps:$4 sm:$0xff]   ;;  %1852 = vmatprep.subr.bf16.mxu0 %v2218_v37  ;;  %v2038_v26 = vld [vmem:[#allocation9 + $0x8] sm:$0xff]  }
  0x88   : > { %927 = vmatprep.mubr.bf16.mxu1 %v2002_v53  ;;  %v2032_v19 = vld [vmem:[#allocation9 + $0x98] sm:$0xff]   ;;  %v2040_v27 = vld [vmem:[#allocation9 + $0x88] sm:$0xff]   ;;  %v2043_v31 = vld [vmem:[#allocation9 + $0xc0] sm:$0xff]  }
  0x89   : > { %928 = vmatmul.mubr.bf16.vlgmr.msra.gmra.mxu1 %v2004_v54  ;;  %v2042_v34 = vld [vmem:[#allocation9] sm:$0xff]   ;;  %v1637_v44 = vld [vmem:[%s2551_s2] ss:$0 sm:$0xff] }
  0x8a   : > { %1853 = vmatpush3.bf16.msra.mxu0 %v2005_v52  ;;  %1798 = vmatpush3.bf16.msra.mxu1 %v2014_v0  ;;  %v2044_v35 = vld [vmem:[#allocation9 + $0x80] sm:$0xff]   ;;  %v2053_v28 = vld [vmem:[#allocation9 + $0x128] sm:$0xff]  }
  0x8b   : > { %1854 = vmatprep.subr.bf16.mxu0 %v2218_v37  ;;  %1799 = vmatprep.subr.bf16.mxu1 %v2017_v3  ;;  %v2054_v30 = vld [vmem:[#allocation9 + $0x120] sm:$0xff]  }
  0x8e   : > { %1855 = vmatpush3.bf16.msra.mxu0 %v2006_v55  ;;  %1800 = vmatpush3.bf16.msra.mxu1 %v2018_v4 }
  0x8f   : > { %1856 = vmatprep.subr.bf16.mxu0 %v2218_v37  ;;  %1801 = vmatprep.subr.bf16.mxu1 %v2021_v8 }
  0x92   : > { %1857 = vmatpush3.bf16.msra.mxu0 %v2007_v56  ;;  %1802 = vmatpush3.bf16.msra.mxu1 %v2022_v9 }
  0x93   : > { %1858 = vmatprep.subr.bf16.mxu0 %v2218_v37  ;;  %1803 = vmatprep.subr.bf16.mxu1 %v2025_v12 }
  0x96   : > { %1859 = vmatpush3.bf16.msra.mxu0 %v2008_v57  ;;  %1804 = vmatpush3.bf16.msra.mxu1 %v2026_v14 }
  0x97   : > { %1860 = vmatprep.subr.bf16.mxu0 %v2218_v37  ;;  %1805 = vmatprep.subr.bf16.mxu1 %v2029_v16 }
  0x9a   : > { %1861 = vmatpush3.bf16.msra.mxu0 %v2009_v58  ;;  %1806 = vmatpush3.bf16.msra.mxu1 %v2030_v18 }
  0x9b   : > { %1862 = vmatprep.subr.bf16.mxu0 %v2218_v37  ;;  %1807 = vmatprep.subr.bf16.mxu1 %v2033_v20 }
  0x9e   : > { %1863 = vmatpush3.bf16.msra.mxu0 %v2010_v59  ;;  %1808 = vmatpush3.bf16.msra.mxu1 %v2034_v22 }
  0x9f   : > { %1864 = vmatprep.subr.bf16.mxu0 %v2218_v37  ;;  %1809 = vmatprep.subr.bf16.mxu1 %v2037_v24 }
  0xa2   : > { %1865 = vmatpush3.bf16.msra.mxu0 %v2011_v60  ;;  %1810 = vmatpush3.bf16.msra.mxu1 %v2038_v26 }
  0xa3   : > { %1819 = vmatprep.subr.bf16.mxu0 %v2015_v1  ;;  %1811 = vmatprep.subr.bf16.mxu1 %v2041_v29 }
  0xa5   : > { %1867 = vmatmul.mubr.bf16.vlgmr.msra.gmra.mxu0 %v2012_v62 }
  0xa6   : > { %1820 = vmatpush3.bf16.msra.mxu0 %v2016_v2  ;;  %1812 = vmatpush3.bf16.msra.mxu1 %v2042_v34 }
  0xa7   : > { %1821 = vmatprep.subr.bf16.mxu0 %v2019_v6  ;;  %1870 = vmatprep.subr.bf16.mxu1 %v2218_v37 }
  0xaa   : > { %1822 = vmatpush3.bf16.msra.mxu0 %v2020_v7 }
  0xab   : > { %1823 = vmatprep.subr.bf16.mxu0 %v2023_v10 }
  0xae   : > { %1824 = vmatpush3.bf16.msra.mxu0 %v2024_v11 }
  0xaf   : > { %1825 = vmatprep.subr.bf16.mxu0 %v2027_v13 }
  0xb2   : > { %1826 = vmatpush3.bf16.msra.mxu0 %v2028_v15 }
  0xb3   : > { %1827 = vmatprep.subr.bf16.mxu0 %v2031_v17 }
  0xb6   : > { %1828 = vmatpush3.bf16.msra.mxu0 %v2032_v19 }
  0xb7   : > { %1829 = vmatprep.subr.bf16.mxu0 %v2035_v21 }
  0xba   : > { %1830 = vmatpush3.bf16.msra.mxu0 %v2036_v23 }
  0xbb   : > { %1831 = vmatprep.subr.bf16.mxu0 %v2039_v25 }
  0xbe   : > { %1832 = vmatpush3.bf16.msra.mxu0 %v2040_v27 }
  0xbf   : > { %1833 = vmatprep.subr.bf16.mxu0 %v2043_v31 }
  0xc2   : > { %1834 = vmatpush3.bf16.msra.mxu0 %v2044_v35 }
 0x145   : > { %v1760_v36 = vpop.f32.mrf.mxu0 }
 0x147   : > { %v1761_v39 = vpop.f32.mrf.mxu0 }
 0x148   : > { %v1762_v43 = vadd.f32 %v1761_v39, %v1760_v36 }
 0x149   : > { %v1782_v40 = vpop.f32.mrf.mxu1  ;;  %v1763_v41 = vpop.f32.mrf.mxu0 }
 0x14a   : > { %v889_v47 = vadd.f32 %v1762_v43, %v1637_v44 }
 0x14b   : > { %v1783_v42 = vpop.f32.mrf.mxu1  ;;  %v1764_v45 = vpop.f32.mrf.mxu0 }
 0x14c   : > { %v1784_v48 = vadd.f32 %v1783_v42, %v1782_v40  ;;  %v1765_v49 = vadd.f32 %v1764_v45, %v1763_v41 }
 0x14d   : > { %v1785_v46 = vpop.f32.mrf.mxu1 }
 0x14e   : > { %v892_v51 = vadd.f32 %v1765_v49, %v1637_v44  ;;  %v930_v53 = vadd.f32 %v1784_v48, %v889_v47 }
 0x14f   : > { %v1786_v50 = vpop.f32.mrf.mxu1 }
 0x150   : > { %v1787_v52 = vadd.f32 %v1786_v50, %v1785_v46 }
 0x152   : > { %v933_v58 = vadd.f32 %v1787_v52, %v892_v51 }
 0x165   : > { %v970_v54 = vpop.f32.mrf.mxu0 }
 0x166   : > { %v971_v55 = vadd.f32 %v970_v54, %v930_v53 }
 0x167   : > { %v1868_v56 = vpop.f32.mrf.mxu0 }
 0x168   : > { %vm977_vm0 = vcmp.ge.f32.partialorder %v971_v55, 0.0  ;;  %v979_v57 = vmul.f32 0.2, %v971_v55 }
 0x169   : > { %v973_v59 = vpop.f32.mrf.mxu0 }
 0x16a   : > { %v981_v60 = vsel %vm977_vm0, %v971_v55, %v979_v57  ;;  %v974_v62 = vadd.f32 %v973_v59, %v933_v58 }
 0x16b   : > { %v1741_v63 = vpack.c.bf16 %v981_v60, %v981_v60  ;;  %v1869_v0 = vpop.f32.mrf.mxu0 }
 0x16c   : > { %vm978_vm1 = vcmp.ge.f32.partialorder %v974_v62, 0.0  ;;  %v980_v1 = vmul.f32 0.2, %v974_v62 }
 0x16d   : > { %v989_v2 = vrot.slane %v1741_v63, 7 }
 0x16e   : > { %v982_v3 = vsel %vm978_vm1, %v974_v62, %v980_v1 }
 0x16f   : > { %997 = vst [vmem:[#allocation2] sm:$0xe] %v989_v2  ;;  %v1742_v4 = vpack.c.bf16 %v982_v3, %v982_v3  ;;  %v990_v6 = vrot.slane %v989_v2, 4 }
 0x171   : > { %v991_v7 = vrot.slane %v1742_v4, 7 }
 0x173   : > { %v992_v8 = vsel %vm2407_vm2, %v990_v6, %v991_v7  ;;  %v993_v9 = vrot.slane %v991_v7, 4 }
 0x174   : > { %998 = vst [vmem:[#allocation2 + $0x4] sm:$0xf] %v992_v8 }
 0x175   : > { %999 = vst [vmem:[#allocation2 + $0x8] sm:$0x1] %v993_v9 }
 0x176   : > { %v1000_v10 = vld [vmem:[#allocation2] sm:$0xf] }
 0x177   : > { %v1004_v11 = vld [vmem:[#allocation2] sm:$0xf]  ;;  %1002 = vst [vmem:[#allocation3] sm:$0xf] %v1000_v10 }
 0x178   : > { %v1008_v12 = vshrl.u32 %v1004_v11, 16  ;;  %v1011_v13 = vshll.u32 %v1004_v11, 16  ;;  %v1035_v14 = vld [vmem:[#allocation2] sm:$0xe] }
 0x179   : > { %v1052_v15 = vld [vmem:[#allocation2] sm:$0xe]  ;;  %v1685_v20 = vrot.slane %v1035_v14, 9 }
 0x17a   : > { %v1056_v16 = vshrl.u32 %v1052_v15, 16  ;;  %v1059_v17 = vshll.u32 %v1052_v15, 16  ;;  %v1010_v18 = vrot.slane %v1008_v12, 4  ;;  %v1013_v19 = vrot.slane %v1011_v13, 5  ;;  %v1087_v23 = vld [vmem:[#allocation2] sm:$0xc] }
 0x17b   : > { %v1001_v38 = vld [vmem:[#allocation2 + $0x4] sm:$0xf]  ;;  %v1686_v42 = vrot.slane %v1087_v23, 10  ;;  %v2051_v13 = vld [vmem:[#allocation9 + $0x138] sm:$0xff]  }
 0x17c   : > { %v1058_v21 = vrot.slane %v1056_v16, 5  ;;  %v1061_v22 = vrot.slane %v1059_v17, 6  ;;  %v1005_v24 = vld [vmem:[#allocation2 + $0x4] sm:$0xf]  ;;  %v1014_v25 = vor.u32 %v1013_v19, %v1010_v18  ;;  %1003 = vst [vmem:[#allocation3 + $0x14] sm:$0xf] %v1001_v38 }
 0x17d   : > { %v1036_v26 = vld [vmem:[#allocation2 + $0x4] sm:$0xf]  ;;  %v1006_v27 = vld [vmem:[#allocation2 + $0x8] sm:$0x1]  ;;  %v1017_v29 = vshll.u32 %v1005_v24, 16  ;;  %v1021_v31 = vshrl.u32 %v1005_v24, 16 }
 0x17e   : > { %v1037_v34 = vld [vmem:[#allocation2 + $0x8] sm:$0x1]  ;;  %v1062_v35 = vor.u32 %v1061_v22, %v1058_v21  ;;  %v1015_v36 = vrot.slane %v1014_v25, 4  ;;  %v1043_v39 = vrot.slane %v1036_v26, 5  ;;  %v1053_v41 = vld [vmem:[#allocation2 + $0x4] sm:$0xf] }
 0x17f   : > { %v1046_v40 = vrot.slane %v1037_v34, 5  ;;  %v1019_v43 = vrot.slane %v1017_v29, 5  ;;  %v1023_v44 = vrot.slane %v1021_v31, 4  ;;  %v1027_v45 = vshll.u32 %v1006_v27, 16  ;;  %v1054_v46 = vld [vmem:[#allocation2 + $0x8] sm:$0x3] }
 0x180   : > { %v1065_v47 = vshrl.u32 %v1053_v41, 16  ;;  %v1044_v48 = vsel %vm2415_vm11, %v1685_v20, %v1043_v39  ;;  %v1045_v49 = vrot.slane %v1043_v39, 4  ;;  %v1063_v50 = vrot.slane %v1062_v35, 4  ;;  %v1088_v52 = vld [vmem:[#allocation2 + $0x4] sm:$0xf]  ;;  %v2052_v17 = vld [vmem:[#allocation9 + $0x130] sm:$0xff]  }
 0x181   : > { %v1068_v51 = vshll.u32 %v1053_v41, 16  ;;  %v1020_v53 = vsel %vm2421_vm12, %v1015_v36, %v1019_v43  ;;  %v1024_v54 = vor.u32 %v1023_v44, %v1019_v43  ;;  %1050 = vst [vmem:[#allocation3 + $0x8] sm:$0xf] %v1044_v48  ;;  %v1075_v56 = vshrl.u32 %v1054_v46, 16  ;;  %v1089_v57 = vld [vmem:[#allocation2 + $0x8] sm:$0x3] }
 0x182   : > { %v1067_v55 = vrot.slane %v1065_v47, 5  ;;  %1033 = vst [vmem:[#allocation3 + $0x4] sm:$0xf] %v1020_v53  ;;  %v1047_v58 = vsel %vm2415_vm11, %v1045_v49, %v1046_v40  ;;  %v1078_v60 = vshll.u32 %v1054_v46, 16  ;;  %v1095_v62 = vrot.slane %v1088_v52, 6  ;;  %v2055_v18 = vld [vmem:[#allocation9 + $0x118] sm:$0xff]  }
 0x183   : > { %v1070_v59 = vrot.slane %v1068_v51, 6  ;;  %v1025_v63 = vrot.slane %v1024_v54, 4  ;;  %v1029_v0 = vrot.slane %v1027_v45, 5  ;;  %1051 = vst [vmem:[#allocation3 + $0x1c] sm:$0xf] %v1047_v58  ;;  %v1077_v1 = vrot.slane %v1075_v56, 5 }
 0x184   : > { %v1098_v2 = vrot.slane %v1089_v57, 6  ;;  %v1080_v4 = vrot.slane %v1078_v60, 6  ;;  %v1096_v6 = vsel %vm2433_vm13, %v1686_v42, %v1095_v62  ;;  %v1097_v7 = vrot.slane %v1095_v62, 4  ;;  %v2045_v14 = vld [vmem:[#allocation3] ss:$20 sps:$4 sm:$0xff]   ;;  %v2056_v19 = vld [vmem:[#allocation9 + $0x110] sm:$0xff]  }
 0x185   : > { %v1071_v3 = vor.u32 %v1070_v59, %v1067_v55  ;;  %v1030_v8 = vsel %vm2421_vm12, %v1025_v63, %v1029_v0  ;;  %1102 = vst [vmem:[#allocation3 + $0x10] sm:$0xf] %v1096_v6  ;;  %v2057_v20 = vld [vmem:[#allocation9 + $0x108] sm:$0xff]   ;;  %v2058_v21 = vld [vmem:[#allocation9 + $0x100] sm:$0xff]  }
 0x186   : > { %1034 = vst [vmem:[#allocation3 + $0x18] sm:$0xf] %v1030_v8  ;;  %v1081_v10 = vor.u32 %v1080_v4, %v1077_v1  ;;  %v1099_v11 = vsel %vm2433_vm13, %v1097_v7, %v1098_v2  ;;  %v1732_v42 = vld [vmem:[%s2553_s4] ss:$0 sm:$0xff] }
 0x187   : > { %v1072_v61 = vsel %vm2439_vm14, %v1063_v50, %v1071_v3  ;;  %v1073_v9 = vrot.slane %v1071_v3, 4  ;;  %1103 = vst [vmem:[#allocation3 + $0x24] sm:$0xf] %v1099_v11 }
 0x188   : > { %1085 = vst [vmem:[#allocation3 + $0xc] sm:$0xf] %v1072_v61 }
 0x189   : > { %v1082_v12 = vsel %vm2439_vm14, %v1073_v9, %v1081_v10 }
 0x18a   : > { %1086 = vst [vmem:[#allocation3 + $0x20] sm:$0xf] %v1082_v12  ;;  %v2048_v15 = vld [vmem:[#allocation3 + $0x8] ss:$20 sps:$4 sm:$0xff]  }
 0x18d   : > { %v2047_v5 = vld [vmem:[#allocation3 + $0x4] ss:$20 sps:$4 sm:$0xff]  }
 0x18e   : > { %1408 = vmatprep.mubr.bf16.mxu1 %v2047_v5  ;;  %v2059_v22 = vld [vmem:[#allocation3 + $0x10] ss:$20 sps:$4 sm:$0xff]  }
 0x18f   : > { %1409 = vmatmul.mubr.bf16.vlgmr.msra.gmra.mxu1 %v2045_v14 }
 0x190   : > { %1871 = vmatpush3.bf16.msra.mxu1 %v2051_v13  ;;  %1886 = vmatprep.mubr.msk.bf16.mxu1 %vm2219_vm15, %v2218_v37 }
 0x191   : > { %v2050_v16 = vld [vmem:[#allocation3 + $0xc] ss:$20 sps:$4 sm:$0xff]   ;;  %1872 = vmatprep.subr.bf16.mxu1 %v2218_v37 }
 0x192   : > { %1449 = vmatprep.mubr.bf16.mxu0 %v2050_v16 }
 0x193   : > { %1450 = vmatmul.mubr.bf16.vlgmr.msra.gmra.mxu0 %v2048_v15 }
 0x194   : > { %1873 = vmatpush3.bf16.msra.mxu1 %v2052_v17 }
 0x195   : > { %1874 = vmatprep.subr.bf16.mxu1 %v2218_v37 }
 0x198   : > { %1875 = vmatpush3.bf16.msra.mxu1 %v2053_v28 }
 0x199   : > { %1876 = vmatprep.subr.bf16.mxu1 %v2218_v37 }
 0x19c   : > { %1877 = vmatpush3.bf16.msra.mxu1 %v2054_v30 }
 0x19d   : > { %1878 = vmatprep.subr.bf16.mxu1 %v2218_v37 }
 0x1a0   : > { %1879 = vmatpush3.bf16.msra.mxu1 %v2055_v18 }
 0x1a1   : > { %1880 = vmatprep.subr.bf16.mxu1 %v2218_v37 }
 0x1a4   : > { %1881 = vmatpush3.bf16.msra.mxu1 %v2056_v19 }
 0x1a5   : > { %1882 = vmatprep.subr.bf16.mxu1 %v2218_v37 }
 0x1a8   : > { %1883 = vmatpush3.bf16.msra.mxu1 %v2057_v20 }
 0x1a9   : > { %1884 = vmatprep.subr.bf16.mxu1 %v2218_v37 }
 0x1ac   : > { %1885 = vmatpush3.bf16.msra.mxu1 %v2058_v21 }
 0x1af   : > { %1887 = vmatmul.mubr.bf16.vlgmr.msra.gmra.mxu1 %v2059_v22 }
 0x24f   : > { %v1813_v23 = vpop.f32.mrf.mxu1 }
 0x251   : > { %v1814_v24 = vpop.f32.mrf.mxu1 }
 0x252   : > { %v1815_v29 = vadd.f32 %v1814_v24, %v1813_v23 }
 0x253   : > { %v1835_v38 = vpop.f32.mrf.mxu0  ;;  %v1816_v26 = vpop.f32.mrf.mxu1 }
 0x255   : > { %v1836_v25 = vpop.f32.mrf.mxu0  ;;  %v1817_v34 = vpop.f32.mrf.mxu1 }
 0x256   : > { %v1837_v31 = vadd.f32 %v1836_v25, %v1835_v38  ;;  %v1818_v36 = vadd.f32 %v1817_v34, %v1816_v26 }
 0x257   : > { %v1838_v27 = vpop.f32.mrf.mxu0 }
 0x258   : > { %v1452_v40 = vadd.f32 %v1837_v31, %v1815_v29 }
 0x259   : > { %v1839_v35 = vpop.f32.mrf.mxu0 }
 0x25a   : > { %v1840_v39 = vadd.f32 %v1839_v35, %v1838_v27 }
 0x25c   : > { %v1455_v45 = vadd.f32 %v1840_v39, %v1818_v36 }
 0x26f   : > { %v1492_v41 = vpop.f32.mrf.mxu1 }
 0x270   : > { %v1493_v37 = vadd.f32 %v1492_v41, %v1452_v40 }
 0x271   : > { %v1888_v43 = vpop.f32.mrf.mxu1 }
 0x272   : > { %v1501_v44 = vadd.f32 %v1493_v37, %v2397_v32 }
 0x273   : > { %v1495_v46 = vpop.f32.mrf.mxu1 }
 0x274   : > { %v1510_v47 = vadd.f32 %v1732_v42, %v1501_v44  ;;  %v1496_v48 = vadd.f32 %v1495_v46, %v1455_v45 }
 0x275   : > { %v1889_v49 = vpop.f32.mrf.mxu1 }
 0x276   : > { %1512 = vst [vmem:[%s271_s11] sm:$0xff] %v1510_v47  ;;  %v1502_v50 = vadd.f32 %v1496_v48, %v2400_v33 }
 0x278   : > { %v1511_v32 = vadd.f32 %v1732_v42, %v1502_v50 }
 0x27a   : > { %1513 = vst [vmem:[%s271_s11 + $0x8] sm:$0xff] %v1511_v32 }
 0x27b   : > { %2153 = shalt.err (!%p2150_p9)
}
 0x27c   : > { %s2154_s30 = scalar_lea.hbm %s2506_s9, 256  ;;  %s2158_s8 = scalar_lea.hbm %s2554_s5, 512 }
 0x27d   : > { %p2155_p13 = scmp.ne.s32.totalorder %s2506_s9, %s2154_s30  ;;  %p2159_p4 = scmp.lt.s32.totalorder %s2506_s9, %s2554_s5 }
 0x27e   : > { %p2160_p8 = scmp.lt.s32.totalorder %s2158_s8, %s2154_s30 }
 0x27f   : > { %p2156_p5 = pnand %p2155_p13, %p2580_p10 }
 0x280   : > { %p2161_p3 = por %p2160_p8, %p2159_p4 }
 0x281   : > { %p2157_p0 = pneg %p2156_p5 }
 0x283   : > { %p2162_p11 = pnand %p2161_p3, %p2157_p0 }
 0x285   : > { %2165 = shalt.err (!%p2162_p11)
}
 0x286   : > { %s2221_s28 = smov 128   ;;  %s2222_s6 = smov 8  }
 0x287   : > { %1900 = dma.vmem_to_hbm [thread:$0]  (%p2580_p10), %s2500_s12, 256, %s2506_s9, %s1515_s13, %s2221_s28, %s2221_s28, %s2222_s6  }
 0x288 PF: > { %s1543_s7 = sand.u32 1, %s2196_s18   ;;  %p2581_p1 = scmp.ne.s32.totalorder %s2560_s25, 0 }
 0x289   : > { %p2582_p2 = scmp.ge.s32.totalorder %s2208_s21, 2  ;;  %s1544_s14 = scalar_lea.sflag [#allocation6], %s1543_s7 }
 0x28b   : > { %p1914_p6 = pnand %p2582_p2, %p2581_p1 }
 0x28d   : > { %p1915_p12 = pneg %p1914_p6 }
 0x28f   : > { %2191 = dma.done.wait (%p1915_p12), %s1544_s14, 256  }
 0x290   : > { %2193 = vsyncadd (%p1915_p12), %s1544_s14, 4294967040  ;;  %p19_p7 = scmp.ge.s32.totalorder %s2325_s15, 4   ;;  %s2583_s18 = smov %s2200_s19 }
 0x291   : > { %s2584_s19 = smov %s2204_s20  ;;  %s2585_s20 = smov %s2341_s27 }
 0x292   : > { %s2586_s21 = smov %s2325_s15  ;;  %21 = sbr.rel (!%p19_p7) target bundleno = 6 (0x6), region = 93 }
 0x297   :  { %1549 = vsyncpa [#allocation5], 1 }
 0x298   :  { %1551 = vsyncpa [#allocation5 + $0x1], 1 }
 0x299   :  { %1552 = vsyncpa [#allocation8], 1 }
 0x29a   :  { %1553 = vsyncpa [#allocation6], 1 }
 0x29b   :  { %1555 = vsyncpa [#allocation6 + $0x1], 1 }

// kernel: scyclone_d_block_ntc.1
= control target key start
LH: loop header
LB: loop body
LE: loop exit
PB: predicated region body
PF: predicated region fallthrough
CT: control target
= control target key end

     0   :  { %10 = vsyncpa [#allocation5], 0  ;;  %s2549_s0 = inlined_call_operand.hbm [shape: f32[32,128], index: 0, kind: input, shape index: {}]   ;;  %s2550_s1 = inlined_call_operand.hbm [shape: bf16[5,128,128], index: 1, kind: input, shape index: {}]   ;;  %s2551_s2 = inlined_call_operand.vmem [shape: f32[1,128], index: 2, kind: input, shape index: {}]   ;;  %s2552_s3 = inlined_call_operand.hbm [shape: bf16[5,128,128], index: 3, kind: input, shape index: {}]   ;;  %s2553_s4 = inlined_call_operand.vmem [shape: f32[1,128], index: 4, kind: input, shape index: {}]   ;;  %s2554_s5 = inlined_call_operand.hbm [shape: f32[32,128], index: 5, kind: output, shape index: {}]  }
   0x1   :  { %12 = vsyncpa [#allocation5 + $0x1], 0 }
   0x2   :  { %13 = vsyncpa [#allocation8], 0 }
   0x3   :  { %14 = vsyncpa [#allocation6], 0 }
   0x4   :  { %16 = vsyncpa [#allocation6 + $0x1], 0  ;;  %s2253_s18 = smov 0   ;;  %s2255_s19 = smov 0  }
   0x5   :  { %s2257_s20 = smov 0   ;;  %s2259_s21 = smov 0  }
   0x6 LB: > { %s2274_s22 = sadd.s32 4294967295, %s2208_s21   ;;  %s1620_s23 = sadd.s32 4294967294, %s2208_s21   ;;  %s2208_s21 = sphi %s2259_s21, %s2586_s21   ;;  %s2204_s20 = sphi %s2257_s20, %s2585_s20   ;;  %s2200_s19 = sphi %s2255_s19, %s2584_s19   ;;  %s2196_s18 = sphi %s2253_s18, %s2583_s18  }
   0x7   : > { %p42_p0 = scmp.ne.s32.totalorder %s2200_s19, %s2196_s18  ;;  %p2555_p1 = scmp.eq.s32.totalorder %s2274_s22, 0 }
   0x8   : > { %p156_p3 = scmp.eq.s32.totalorder %s1620_s23, 1  ;;  %p1621_p5 = scmp.ge.s32.totalorder %s2208_s21, 1 }
   0x9   : > { %p2283_p4 = por %p2555_p1, %p42_p0  ;;  %p163_p7 = scmp.lt.s32.totalorder %s2208_s21, 3 }
   0xa   : > { %p2288_p6 = por %p156_p3, %p42_p0  ;;  %s2210_s27 = smov [#allocation7]  }
   0xb   : > { %s2559_s24 = scalar_select %p2283_p4, 1, 0 }
   0xc   : > { %s2560_s25 = scalar_select %p2288_p6, 1, 0 }
   0xd   : > { %p2293_p8 = pnand %p1621_p5, %p163_p7  ;;  %s175_s28 = sshll.u32 %s2210_s27, 4  ;;  %s176_s28 = int_to_ptr.vmem [resolvable:$true] %s175_s28 }
   0xe   : > { %s2211_s30 = smov [#allocation9]   ;;  %s2071_s7 = scalar_lea.vmem %s176_s28, 5120 }
   0xf   : > { %s2561_s26 = scalar_select %p2293_p8, 1, 0 }
  0x10   : > { %p1902_p9 = pneg %p2293_p8  ;;  %s191_s6 = sshll.u32 %s2211_s30, 4  ;;  %s192_s6 = int_to_ptr.vmem [resolvable:$true] %s191_s6 }
  0x11   : > { %p2072_p13 = scmp.ne.s32.totalorder %s176_s28, %s2071_s7  ;;  %p2079_p5 = scmp.lt.s32.totalorder %s176_s28, %s176_s28 }
  0x12   : > { %p2302_p11 = pnand %p1902_p9, %p2555_p1  ;;  %p2080_p7 = scmp.lt.s32.totalorder %s2071_s7, %s2071_s7 }
  0x14   : > { %p2062_p12 = pneg %p2302_p11  ;;  %p2081_p10 = por %p2080_p7, %p2079_p5 }
  0x16   : > { %p2074_p0 = pnand %p2072_p13, %p2062_p12 }
  0x18   : > { %p2075_p3 = pneg %p2074_p0 }
  0x1a   : > { %p2082_p9 = pnand %p2081_p10, %p2075_p3 }
  0x1c   : > { %2085 = shalt.err (!%p2082_p9)
}
  0x1d   : > { %s2212_s8 = smov 64   ;;  %s2213_s9 = smov 4  }
  0x1e   : > { %1905 = dma.hbm_to_vmem [thread:$0]  (!%p2302_p11), %s2550_s1, 5120, %s176_s28, [#allocation8], %s2212_s8, %s2212_s8, %s2213_s9  }
  0x1f   : > { %s2097_s12 = scalar_lea.vmem %s192_s6, 5120  ;;  %p2105_p2 = scmp.lt.s32.totalorder %s192_s6, %s192_s6 }
  0x20   : > { %p2098_p1 = scmp.ne.s32.totalorder %s192_s6, %s2097_s12  ;;  %p2106_p6 = scmp.lt.s32.totalorder %s2097_s12, %s2097_s12 }
  0x22   : > { %p2100_p13 = pnand %p2098_p1, %p2062_p12  ;;  %p2107_p5 = por %p2106_p6, %p2105_p2 }
  0x24   : > { %p2101_p0 = pneg %p2100_p13 }
  0x26   : > { %p2108_p10 = pnand %p2107_p5, %p2101_p0 }
  0x28   : > { %2111 = shalt.err (!%p2108_p10)
}
  0x29   : > { %1908 = dma.hbm_to_vmem [thread:$0]  (!%p2302_p11), %s2552_s3, 5120, %s192_s6, [#allocation8], %s2212_s8, %s2212_s8, %s2213_s9  }
  0x2a   : > { %s2325_s15 = sadd.s32 1, %s2208_s21   ;;  %s29_s16 = sadd.s32 1, %s2204_s20 }
  0x2b   : > { %s26_s17 = ssub.s32 %s2208_s21, %s2325_s15  ;;  %p36_p1 = scmp.ne.s32.totalorder %s2204_s20, %s2200_s19 }
  0x2c   : > { %p27_p2 = scmp.eq.s32.totalorder %s26_s17, 0  ;;  %p37_p6 = scmp.eq.s32.totalorder %s2208_s21, 0 }
  0x2d   : > { %p2563_p12 = scmp.eq.s32.totalorder %s2274_s22, 1  ;;  %p1919_p7 = scmp.lt.s32.totalorder %s2208_s21, 2 }
  0x2e   : > { %s2341_s27 = scalar_select %p27_p2, %s2204_s20, %s29_s16  }
  0x2f   : > { %p2335_p3 = por %p2563_p12, %p36_p1  ;;  %p38_p9 = por %p37_p6, %p36_p1 }
  0x30   : > { %s208_s28 = sand.u32 1, %s2204_s20   ;;  %s1738_s30 = sshll.u32 %s2208_s21, 8 }
  0x31   : > { %s2564_s23 = scalar_select %p2335_p3, 1, 0 }
  0x32   : > { %s1625_s29 = sshll.u32 %s208_s28, 4  ;;  %s2348_s8 = scalar_lea.hbm %s2549_s0, %s1738_s30 }
  0x33   : > { %s212_s9 = scalar_lea.vmem [#allocation4], %s1625_s29  ;;  %p2352_p11 = pnand %p1919_p7, %p38_p9 }
  0x34   : > { %s219_s10 = sshll.u32 %s212_s9, 4  ;;  %s2356_s12 = scalar_lea.sflag [#allocation5], %s208_s28  ;;  %s2350_s10 = int_to_ptr.vmem [resolvable:$true] %s219_s10 }
  0x35   : > { %s2112_s13 = scalar_lea.hbm %s2348_s8, 256  ;;  %p2114_p0 = pneg %p2352_p11 }
  0x36   : > { %p2113_p13 = scmp.ne.s32.totalorder %s2348_s8, %s2112_s13  ;;  %s2117_s17 = scalar_lea.hbm %s2549_s0, 512 }
  0x37   : > { %p2118_p1 = scmp.lt.s32.totalorder %s2348_s8, %s2549_s0  ;;  %p2119_p2 = scmp.lt.s32.totalorder %s2117_s17, %s2112_s13 }
  0x38   : > { %p2115_p5 = pnand %p2114_p0, %p2113_p13 }
  0x39   : > { %p2120_p6 = por %p2119_p2, %p2118_p1 }
  0x3a   : > { %p2116_p10 = pneg %p2115_p5 }
  0x3c   : > { %p2121_p12 = pnand %p2120_p6, %p2116_p10 }
  0x3e   : > { %2124 = shalt.err (!%p2121_p12)
}
  0x3f   : > { %s2125_s28 = scalar_lea.vmem %s2350_s10, 256  ;;  %s2214_s6 = smov [#allocation4]  }
  0x40   : > { %p2126_p7 = scmp.ne.s32.totalorder %s2350_s10, %s2125_s28  ;;  %s2130_s7 = sshll.u32 %s2214_s6, 4  ;;  %s2131_s7 = int_to_ptr.vmem [resolvable:$false] %s2130_s7 }
  0x41   : > { %s2132_s9 = scalar_lea.vmem %s2131_s7, 512  ;;  %p2133_p5 = scmp.lt.s32.totalorder %s2350_s10, %s2131_s7 }
  0x42   : > { %p2128_p9 = pnand %p2126_p7, %p2114_p0  ;;  %p2134_p3 = scmp.lt.s32.totalorder %s2132_s9, %s2125_s28 }
  0x44   : > { %p2129_p13 = pneg %p2128_p9  ;;  %p2135_p4 = por %p2134_p3, %p2133_p5 }
  0x46   : > { %p2136_p8 = pnand %p2135_p4, %p2129_p13 }
  0x48   : > { %2139 = shalt.err (!%p2136_p8)
}
  0x49   : > { %s2215_s13 = smov 128   ;;  %s2216_s14 = smov 8  }
  0x4a   : > { %1912 = dma.hbm_to_vmem [thread:$0]  (!%p2352_p11), %s2348_s8, 256, %s2350_s10, %s2356_s12, %s2215_s13, %s2215_s13, %s2216_s14  }
  0x4b   : > { %p2566_p0 = scmp.ne.s32.totalorder %s2561_s26, 0 }
  0x4c   : > { %s2380_s16 = sand.u32 (!%p2566_p0), 1, %s2200_s19   ;;  %p2567_p4 = scmp.ne.s32.totalorder (!%p2566_p0), %s2559_s24, 0 }
  0x4d   : > { %231 = sbr.rel (%p2566_p0) target bundleno = 648 (0x288), region = 40  ;;  %s1629_s17 = sshll.u32 (!%p2566_p0), %s2380_s16, 4 }
  0x4e   : > { %s234_s29 = scalar_lea.sflag (!%p2566_p0), [#allocation5], %s2380_s16  ;;  %s2386_s30 = scalar_lea.vmem (!%p2566_p0), [#allocation4], %s1629_s17 }
  0x52   : > { %2183 = dma.done.wait (%p2567_p4), %s234_s29, 256  }
  0x53   : > { %2185 = vsyncadd (%p2567_p4), %s234_s29, 4294967040  ;;  %p2568_p8 = scmp.eq.s32.totalorder %s2274_s22, 0 }
  0x55   : > { %2187 = dma.done.wait (%p2568_p8), [#allocation8], 10240   ;;  %p2569_p3 = pmov %p2568_p8 }
  0x56   : > { %v2217_v0 = vmov 0   ;;  %v1966_v1 = vld [vmem:[#allocation7 + $0x78] sm:$0xff]   ;;  %v1969_v4 = vld [vmem:[#allocation7 + $0x70] sm:$0xff]   ;;  %v1973_v8 = vld [vmem:[#allocation7 + $0x68] sm:$0xff]   ;;  %vm285_vm0 = vcmask 1040384   ;;  %vm286_vm1 = vcmask 1044484  }
  0x57   : > { %2189 = vsyncadd (%p2569_p3), [#allocation8], 4294957056  ;;  %275 = vst [vmem:[#allocation2] sm:$0x1] %v2217_v0  ;;  %v1967_v2 = vld [vmem:[#allocation7 + $0x38] sm:$0xff]   ;;  %1744 = vmatprep.subr.bf16.mxu0 %v1966_v1  ;;  %v1971_v6 = vld [vmem:[#allocation7 + $0x30] sm:$0xff]  }
  0x58   : > { %276 = vst [vmem:[#allocation2 + $0x8] sm:$0x2] %v2217_v0  ;;  %v1968_v3 = vld [vmem:[#allocation7 + $0xf8] sm:$0xff]   ;;  %1745 = vmatpush3.bf16.msra.mxu0 %v1967_v2  ;;  %v1972_v7 = vld [vmem:[#allocation7 + $0xf0] sm:$0xff]   ;;  %v1975_v10 = vld [vmem:[#allocation7 + $0x28] sm:$0xff]   ;;  %v2218_v37 = vmov 0.0  }
  0x59   : > { %1766 = vmatprep.subr.bf16.mxu1 %v1968_v3  ;;  %v1970_v5 = vld [vmem:[#allocation7 + $0xb8] sm:$0xff]   ;;  %1746 = vmatprep.subr.bf16.mxu0 %v1969_v4  ;;  %v1974_v9 = vld [vmem:[#allocation7 + $0xb0] sm:$0xff]   ;;  %v1976_v11 = vld [vmem:[#allocation7 + $0xe8] sm:$0xff]   ;;  %vm466_vm3 = vsmask.f32 3328  ;;  %vm503_vm5 = vcmask 1042432  }
  0x5a   : > { %1767 = vmatpush3.bf16.msra.mxu1 %v1970_v5  ;;  %v1977_v12 = vld [vmem:[#allocation7 + $0x60] sm:$0xff]   ;;  %v1978_v13 = vld [vmem:[#allocation7 + $0xa8] sm:$0xff]   ;;  %v1981_v16 = vld [vmem:[#allocation7 + $0x58] sm:$0xff]   ;;  %vm467_vm4 = vsmask.f32 7440  ;;  %vm504_vm6 = vcmask 1046532  }
  0x5b   : > { %1768 = vmatprep.subr.bf16.mxu1 %v1972_v7  ;;  %v1979_v14 = vld [vmem:[#allocation7 + $0x20] sm:$0xff]   ;;  %v1983_v18 = vld [vmem:[#allocation7 + $0x18] sm:$0xff]   ;;  %v1985_v20 = vld [vmem:[#allocation7 + $0x50] sm:$0xff]   ;;  %vm561_vm7 = vcmask 1041408   ;;  %vm520_vm8 = vsmask.f32 2304 }
  0x5c   : > { %1747 = vmatpush3.bf16.msra.mxu0 %v1971_v6  ;;  %v1980_v15 = vld [vmem:[#allocation7 + $0xe0] sm:$0xff]   ;;  %v1984_v19 = vld [vmem:[#allocation7 + $0xd8] sm:$0xff]   ;;  %v1987_v22 = vld [vmem:[#allocation7 + $0x10] sm:$0xff]   ;;  %vm521_vm9 = vsmask.f32 6416  ;;  %vm562_vm10 = vcmask 1045508  }
  0x5d   : > { %1748 = vmatprep.subr.bf16.mxu0 %v1973_v8  ;;  %v1982_v17 = vld [vmem:[#allocation7 + $0xa0] sm:$0xff]   ;;  %v1986_v21 = vld [vmem:[#allocation7 + $0x98] sm:$0xff]   ;;  %v1988_v23 = vld [vmem:[#allocation7 + $0xd0] sm:$0xff]   ;;  %vm2219_vm15 = vmmov 0   ;;  %s271_s11 = scalar_lea.vmem [#allocation10], %s1629_s17  ;;  %s1743_s28 = sshll.u32 %s2274_s22, 8 }
  0x5e   : > { %1769 = vmatpush3.bf16.msra.mxu1 %v1974_v9  ;;  %v1989_v24 = vld [vmem:[#allocation7 + $0x48] sm:$0xff]   ;;  %v1990_v25 = vld [vmem:[#allocation7 + $0x90] sm:$0xff]   ;;  %v1993_v28 = vld [vmem:[#allocation7 + $0x40] sm:$0xff]   ;;  %s1528_s12 = sshll.u32 %s271_s11, 4  ;;  %s2506_s9 = scalar_lea.hbm %s2554_s5, %s1743_s28  ;;  %s2500_s12 = int_to_ptr.vmem [resolvable:$true] %s1528_s12 }
  0x5f   : > { %1770 = vmatprep.subr.bf16.mxu1 %v1976_v11  ;;  %v1991_v26 = vld [vmem:[#allocation7 + $0x8] sm:$0xff]   ;;  %v1995_v30 = vld [vmem:[#allocation7] sm:$0xff]   ;;  %vm2407_vm2 = vmor %vm285_vm0, %vm286_vm1  ;;  %s1515_s13 = scalar_lea.sflag [#allocation6], %s2380_s16  ;;  %s2140_s14 = scalar_lea.vmem %s2500_s12, 256 }
  0x60   : > { %1749 = vmatpush3.bf16.msra.mxu0 %v1975_v10  ;;  %v1992_v27 = vld [vmem:[#allocation7 + $0xc8] sm:$0xff]   ;;  %v1996_v31 = vld [vmem:[#allocation7 + $0xc0] sm:$0xff]   ;;  %vm2415_vm11 = vmor %vm503_vm5, %vm504_vm6  ;;  %p2141_p11 = scmp.ne.s32.totalorder %s2500_s12, %s2140_s14  ;;  %p2580_p10 = scmp.ne.s32.totalorder %s2564_s23, 0 }
  0x61   : > { %1750 = vmatprep.subr.bf16.mxu0 %v1977_v12  ;;  %v1994_v29 = vld [vmem:[#allocation7 + $0x88] sm:$0xff]   ;;  %v2397_v32 = vld [vmem:[%s2386_s30] sm:$0xff]  ;;  %vm2421_vm12 = vmor %vm466_vm3, %vm467_vm4  ;;  %s2220_s22 = smov [#allocation10]  }
  0x62   : > { %1771 = vmatpush3.bf16.msra.mxu1 %v1978_v13  ;;  %v2400_v33 = vld [vmem:[%s2386_s30 + $0x8] sm:$0xff]  ;;  %v1739_v34 = vpack.c.bf16 %v2397_v32, %v2397_v32  ;;  %v1999_v36 = vld [vmem:[#allocation7 + $0x80] sm:$0xff]   ;;  %vm2433_vm13 = vmor %vm561_vm7, %vm562_vm10  ;;  %p2142_p1 = pnand %p2141_p11, %p2580_p10  ;;  %s2144_s17 = sshll.u32 %s2220_s22, 4  ;;  %s2145_s17 = int_to_ptr.vmem [resolvable:$false] %s2144_s17 }
  0x63   : > { %1772 = vmatprep.subr.bf16.mxu1 %v1980_v15  ;;  %v1740_v35 = vpack.c.bf16 %v2400_v33, %v2400_v33  ;;  %vm2439_vm14 = vmor %vm520_vm8, %vm521_vm9  ;;  %s2146_s29 = scalar_lea.vmem %s2145_s17, 512  ;;  %p2147_p6 = scmp.lt.s32.totalorder %s2500_s12, %s2145_s17 }
  0x64   : > { %1751 = vmatpush3.bf16.msra.mxu0 %v1979_v14  ;;  %v288_v39 = vrot.slane %v1739_v34, 7  ;;  %p2143_p2 = pneg %p2142_p1  ;;  %p2148_p12 = scmp.lt.s32.totalorder %s2146_s29, %s2140_s14 }
  0x65   : > { %1752 = vmatprep.subr.bf16.mxu0 %v1981_v16  ;;  %v290_v40 = vrot.slane %v1740_v35, 7 }
  0x66   : > { %1773 = vmatpush3.bf16.msra.mxu1 %v1982_v17  ;;  %v289_v41 = vrot.slane %v288_v39, 4  ;;  %296 = vst [vmem:[#allocation2] sm:$0xe] %v288_v39  ;;  %p2149_p7 = por %p2148_p12, %p2147_p6 }
  0x67   : > { %1774 = vmatprep.subr.bf16.mxu1 %v1984_v19  ;;  %v292_v42 = vrot.slane %v290_v40, 4 }
  0x68   : > { %1753 = vmatpush3.bf16.msra.mxu0 %v1983_v18  ;;  %v291_v43 = vsel %vm2407_vm2, %v289_v41, %v290_v40  ;;  %p2150_p9 = pnand %p2149_p7, %p2143_p2 }
  0x69   : > { %1754 = vmatprep.subr.bf16.mxu0 %v1985_v20  ;;  %298 = vst [vmem:[#allocation2 + $0x8] sm:$0x1] %v292_v42  ;;  %297 = vst [vmem:[#allocation2 + $0x4] sm:$0xf] %v291_v43 }
  0x6a   : > { %1775 = vmatpush3.bf16.msra.mxu1 %v1986_v21 }
  0x6b   : > { %1776 = vmatprep.subr.bf16.mxu1 %v1988_v23 }
  0x6c   : > { %1755 = vmatpush3.bf16.msra.mxu0 %v1987_v22 }
  0x6d   : > { %1756 = vmatprep.subr.bf16.mxu0 %v1989_v24  ;;  %v459_v44 = vld [vmem:[#allocation2] sm:$0xf] }
  0x6e   : > { %1777 = vmatpush3.bf16.msra.mxu1 %v1990_v25  ;;  %v463_v45 = vld [vmem:[#allocation2] sm:$0xf]  ;;  %461 = vst [vmem:[#allocation3] sm:$0xf] %v459_v44 }
  0x6f   : > { %1778 = vmatprep.subr.bf16.mxu1 %v1992_v27  ;;  %v497_v46 = vld [vmem:[#allocation2] sm:$0xe]  ;;  %v470_v47 = vshrl.u32 %v463_v45, 16  ;;  %v473_v48 = vshll.u32 %v463_v45, 16 }
  0x70   : > { %1757 = vmatpush3.bf16.msra.mxu0 %v1991_v26  ;;  %v1635_v49 = vrot.slane %v497_v46, 9  ;;  %v465_v50 = vld [vmem:[#allocation2 + $0x8] sm:$0x1]  ;;  %v517_v52 = vld [vmem:[#allocation2] sm:$0xe] }
  0x71   : > { %1758 = vmatprep.subr.bf16.mxu0 %v1993_v28  ;;  %v499_v51 = vld [vmem:[#allocation2 + $0x8] sm:$0x1]  ;;  %v460_v53 = vld [vmem:[#allocation2 + $0x4] sm:$0xf]  ;;  %v472_v55 = vrot.slane %v470_v47, 4  ;;  %v475_v56 = vrot.slane %v473_v48, 5 }
  0x72   : > { %1779 = vmatpush3.bf16.msra.mxu1 %v1994_v29  ;;  %v464_v54 = vld [vmem:[#allocation2 + $0x4] sm:$0xf]  ;;  %462 = vst [vmem:[#allocation3 + $0x14] sm:$0xf] %v460_v53  ;;  %v489_v59 = vshll.u32 %v465_v50, 16  ;;  %v511_v62 = vrot.slane %v499_v51, 5 }
  0x73   : > { %1780 = vmatprep.subr.bf16.mxu1 %v1996_v31  ;;  %v479_v57 = vshll.u32 %v464_v54, 16  ;;  %v483_v58 = vshrl.u32 %v464_v54, 16  ;;  %v498_v60 = vld [vmem:[#allocation2 + $0x4] sm:$0xf]  ;;  %v519_v63 = vld [vmem:[#allocation2 + $0x8] sm:$0x3]  ;;  %v476_v0 = vor.u32 %v475_v56, %v472_v55 }
  0x74   : > { %1759 = vmatpush3.bf16.msra.mxu0 %v1995_v30  ;;  %v508_v1 = vrot.slane %v498_v60, 5  ;;  %v518_v2 = vld [vmem:[#allocation2 + $0x4] sm:$0xf]  ;;  %v524_v3 = vshrl.u32 %v517_v52, 16  ;;  %v527_v4 = vshll.u32 %v517_v52, 16  ;;  %v491_v8 = vrot.slane %v489_v59, 5 }
  0x75   : > { %1850 = vmatprep.subr.bf16.mxu0 %v2218_v37  ;;  %v481_v6 = vrot.slane %v479_v57, 5  ;;  %v485_v7 = vrot.slane %v483_v58, 4  ;;  %v533_v9 = vshrl.u32 %v518_v2, 16  ;;  %v555_v10 = vld [vmem:[#allocation2] sm:$0xc]  ;;  %v477_v11 = vrot.slane %v476_v0, 4 }
  0x76   : > { %1781 = vmatpush3.bf16.msra.mxu1 %v1999_v36  ;;  %v509_v12 = vsel %vm2415_vm11, %v1635_v49, %v508_v1  ;;  %v510_v13 = vrot.slane %v508_v1, 4  ;;  %v526_v14 = vrot.slane %v524_v3, 5  ;;  %v556_v15 = vld [vmem:[#allocation2 + $0x4] sm:$0xf]  ;;  %v529_v17 = vrot.slane %v527_v4, 6  ;;  %v2001_v49 = vld [vmem:[#allocation7 + $0x138] sm:$0xff]  }
  0x77   : > { %v486_v16 = vor.u32 %v485_v7, %v481_v6  ;;  %515 = vst [vmem:[#allocation3 + $0x8] sm:$0xf] %v509_v12  ;;  %v535_v18 = vrot.slane %v533_v9, 5  ;;  %v536_v19 = vshll.u32 %v518_v2, 16  ;;  %v557_v20 = vld [vmem:[#allocation2 + $0x8] sm:$0x3]  ;;  %v482_v21 = vsel %vm2421_vm12, %v477_v11, %v481_v6 }
  0x78   : > { %v512_v22 = vsel %vm2415_vm11, %v510_v13, %v511_v62  ;;  %v543_v23 = vshrl.u32 %v519_v63, 16  ;;  %v546_v24 = vshll.u32 %v519_v63, 16  ;;  %495 = vst [vmem:[#allocation3 + $0x4] sm:$0xf] %v482_v21  ;;  %v530_v26 = vor.u32 %v529_v17, %v526_v14  ;;  %v2005_v52 = vld [vmem:[#allocation7 + $0x130] sm:$0xff]   ;;  %v2006_v55 = vld [vmem:[#allocation7 + $0x128] sm:$0xff]  }
  0x79   : > { %v487_v25 = vrot.slane %v486_v16, 4  ;;  %516 = vst [vmem:[#allocation3 + $0x1c] sm:$0xf] %v512_v22  ;;  %v538_v27 = vrot.slane %v536_v19, 6  ;;  %v1636_v29 = vrot.slane %v555_v10, 10  ;;  %v566_v35 = vrot.slane %v556_v15, 6 }
  0x7a   : > { %v545_v31 = vrot.slane %v543_v23, 5  ;;  %v548_v34 = vrot.slane %v546_v24, 6  ;;  %v569_v36 = vrot.slane %v557_v20, 6  ;;  %v531_v40 = vrot.slane %v530_v26, 4  ;;  %v2000_v51 = vld [vmem:[#allocation3] ss:$20 sps:$4 sm:$0xff]  }
  0x7b   : > { %v492_v39 = vsel %vm2421_vm12, %v487_v25, %v491_v8  ;;  %v539_v41 = vor.u32 %v538_v27, %v535_v18  ;;  %v567_v43 = vsel %vm2433_vm13, %v1636_v29, %v566_v35  ;;  %v568_v44 = vrot.slane %v566_v35, 4  ;;  %v2007_v56 = vld [vmem:[#allocation7 + $0x120] sm:$0xff]   ;;  %v2008_v57 = vld [vmem:[#allocation7 + $0x118] sm:$0xff]   ;;  %v2009_v58 = vld [vmem:[#allocation7 + $0x110] sm:$0xff]  }
  0x7c   : > { %496 = vst [vmem:[#allocation3 + $0x18] sm:$0xf] %v492_v39  ;;  %v549_v42 = vor.u32 %v548_v34, %v545_v31  ;;  %573 = vst [vmem:[#allocation3 + $0x10] sm:$0xf] %v567_v43  ;;  %v2010_v59 = vld [vmem:[#allocation7 + $0x108] sm:$0xff]   ;;  %v2011_v60 = vld [vmem:[#allocation7 + $0x100] sm:$0xff]  }
  0x7d   : > { %v540_v45 = vsel %vm2439_vm14, %v531_v40, %v539_v41  ;;  %v541_v46 = vrot.slane %v539_v41, 4  ;;  %v570_v47 = vsel %vm2433_vm13, %v568_v44, %v569_v36  ;;  %v2013_v63 = vld [vmem:[#allocation9 + $0x78] sm:$0xff]   ;;  %v2017_v3 = vld [vmem:[#allocation9 + $0x70] sm:$0xff]   ;;  %v2021_v8 = vld [vmem:[#allocation9 + $0x68] sm:$0xff]  }
  0x7e   : > { %553 = vst [vmem:[#allocation3 + $0xc] sm:$0xf] %v540_v45  ;;  %574 = vst [vmem:[#allocation3 + $0x24] sm:$0xf] %v570_v47  ;;  %v2014_v0 = vld [vmem:[#allocation9 + $0x38] sm:$0xff]   ;;  %1797 = vmatprep.subr.bf16.mxu1 %v2013_v63  ;;  %v2018_v4 = vld [vmem:[#allocation9 + $0x30] sm:$0xff]  }
  0x7f   : > { %v550_v48 = vsel %vm2439_vm14, %v541_v46, %v549_v42  ;;  %v2015_v1 = vld [vmem:[#allocation9 + $0xf8] sm:$0xff]   ;;  %v2019_v6 = vld [vmem:[#allocation9 + $0xf0] sm:$0xff]   ;;  %v2022_v9 = vld [vmem:[#allocation9 + $0x28] sm:$0xff]  }
  0x80   : > { %554 = vst [vmem:[#allocation3 + $0x20] sm:$0xf] %v550_v48  ;;  %v2004_v54 = vld [vmem:[#allocation3 + $0x8] ss:$20 sps:$4 sm:$0xff]   ;;  %v2016_v2 = vld [vmem:[#allocation9 + $0xb8] sm:$0xff]   ;;  %v2023_v10 = vld [vmem:[#allocation9 + $0xe8] sm:$0xff]  }
  0x81   : > { %v2020_v7 = vld [vmem:[#allocation9 + $0xb0] sm:$0xff]   ;;  %v2024_v11 = vld [vmem:[#allocation9 + $0xa8] sm:$0xff]   ;;  %v2025_v12 = vld [vmem:[#allocation9 + $0x60] sm:$0xff]  }
  0x82   : > { %v2027_v13 = vld [vmem:[#allocation9 + $0xe0] sm:$0xff]   ;;  %v2029_v16 = vld [vmem:[#allocation9 + $0x58] sm:$0xff]   ;;  %v2033_v20 = vld [vmem:[#allocation9 + $0x50] sm:$0xff]  }
  0x83   : > { %v1997_v50 = vld [vmem:[#allocation3 + $0x4] ss:$20 sps:$4 sm:$0xff]   ;;  %v2026_v14 = vld [vmem:[#allocation9 + $0x20] sm:$0xff]   ;;  %v2037_v24 = vld [vmem:[#allocation9 + $0x48] sm:$0xff]  }
  0x84   : > { %886 = vmatprep.mubr.bf16.mxu0 %v1997_v50  ;;  %v2028_v15 = vld [vmem:[#allocation9 + $0xa0] sm:$0xff]   ;;  %v2031_v17 = vld [vmem:[#allocation9 + $0xd8] sm:$0xff]   ;;  %v2035_v21 = vld [vmem:[#allocation9 + $0xd0] sm:$0xff]  }
  0x85   : > { %887 = vmatmul.mubr.bf16.vlgmr.msra.gmra.mxu0 %v2000_v51  ;;  %v2012_v62 = vld [vmem:[#allocation3 + $0x10] ss:$20 sps:$4 sm:$0xff]   ;;  %v2034_v22 = vld [vmem:[#allocation9 + $0x10] sm:$0xff]   ;;  %v2041_v29 = vld [vmem:[#allocation9 + $0x40] sm:$0xff]  }
  0x86   : > { %1851 = vmatpush3.bf16.msra.mxu0 %v2001_v49  ;;  %1866 = vmatprep.mubr.msk.bf16.mxu0 %vm2219_vm15, %v2218_v37  ;;  %v2030_v18 = vld [vmem:[#allocation9 + $0x18] sm:$0xff]   ;;  %v2036_v23 = vld [vmem:[#allocation9 + $0x90] sm:$0xff]   ;;  %v2039_v25 = vld [vmem:[#allocation9 + $0xc8] sm:$0xff]  }
  0x87   : > { %v2002_v53 = vld [vmem:[#allocation3 + $0xc] ss:$20 sps:$4 sm:$0xff]   ;;  %1852 = vmatprep.subr.bf16.mxu0 %v2218_v37  ;;  %v2038_v26 = vld [vmem:[#allocation9 + $0x8] sm:$0xff]  }
  0x88   : > { %927 = vmatprep.mubr.bf16.mxu1 %v2002_v53  ;;  %v2032_v19 = vld [vmem:[#allocation9 + $0x98] sm:$0xff]   ;;  %v2040_v27 = vld [vmem:[#allocation9 + $0x88] sm:$0xff]   ;;  %v2043_v31 = vld [vmem:[#allocation9 + $0xc0] sm:$0xff]  }
  0x89   : > { %928 = vmatmul.mubr.bf16.vlgmr.msra.gmra.mxu1 %v2004_v54  ;;  %v2042_v34 = vld [vmem:[#allocation9] sm:$0xff]   ;;  %v1637_v44 = vld [vmem:[%s2551_s2] ss:$0 sm:$0xff] }
  0x8a   : > { %1853 = vmatpush3.bf16.msra.mxu0 %v2005_v52  ;;  %1798 = vmatpush3.bf16.msra.mxu1 %v2014_v0  ;;  %v2044_v35 = vld [vmem:[#allocation9 + $0x80] sm:$0xff]   ;;  %v2053_v28 = vld [vmem:[#allocation9 + $0x128] sm:$0xff]  }
  0x8b   : > { %1854 = vmatprep.subr.bf16.mxu0 %v2218_v37  ;;  %1799 = vmatprep.subr.bf16.mxu1 %v2017_v3  ;;  %v2054_v30 = vld [vmem:[#allocation9 + $0x120] sm:$0xff]  }
  0x8e   : > { %1855 = vmatpush3.bf16.msra.mxu0 %v2006_v55  ;;  %1800 = vmatpush3.bf16.msra.mxu1 %v2018_v4 }
  0x8f   : > { %1856 = vmatprep.subr.bf16.mxu0 %v2218_v37  ;;  %1801 = vmatprep.subr.bf16.mxu1 %v2021_v8 }
  0x92   : > { %1857 = vmatpush3.bf16.msra.mxu0 %v2007_v56  ;;  %1802 = vmatpush3.bf16.msra.mxu1 %v2022_v9 }
  0x93   : > { %1858 = vmatprep.subr.bf16.mxu0 %v2218_v37  ;;  %1803 = vmatprep.subr.bf16.mxu1 %v2025_v12 }
  0x96   : > { %1859 = vmatpush3.bf16.msra.mxu0 %v2008_v57  ;;  %1804 = vmatpush3.bf16.msra.mxu1 %v2026_v14 }
  0x97   : > { %1860 = vmatprep.subr.bf16.mxu0 %v2218_v37  ;;  %1805 = vmatprep.subr.bf16.mxu1 %v2029_v16 }
  0x9a   : > { %1861 = vmatpush3.bf16.msra.mxu0 %v2009_v58  ;;  %1806 = vmatpush3.bf16.msra.mxu1 %v2030_v18 }
  0x9b   : > { %1862 = vmatprep.subr.bf16.mxu0 %v2218_v37  ;;  %1807 = vmatprep.subr.bf16.mxu1 %v2033_v20 }
  0x9e   : > { %1863 = vmatpush3.bf16.msra.mxu0 %v2010_v59  ;;  %1808 = vmatpush3.bf16.msra.mxu1 %v2034_v22 }
  0x9f   : > { %1864 = vmatprep.subr.bf16.mxu0 %v2218_v37  ;;  %1809 = vmatprep.subr.bf16.mxu1 %v2037_v24 }
  0xa2   : > { %1865 = vmatpush3.bf16.msra.mxu0 %v2011_v60  ;;  %1810 = vmatpush3.bf16.msra.mxu1 %v2038_v26 }
  0xa3   : > { %1819 = vmatprep.subr.bf16.mxu0 %v2015_v1  ;;  %1811 = vmatprep.subr.bf16.mxu1 %v2041_v29 }
  0xa5   : > { %1867 = vmatmul.mubr.bf16.vlgmr.msra.gmra.mxu0 %v2012_v62 }
  0xa6   : > { %1820 = vmatpush3.bf16.msra.mxu0 %v2016_v2  ;;  %1812 = vmatpush3.bf16.msra.mxu1 %v2042_v34 }
  0xa7   : > { %1821 = vmatprep.subr.bf16.mxu0 %v2019_v6  ;;  %1870 = vmatprep.subr.bf16.mxu1 %v2218_v37 }
  0xaa   : > { %1822 = vmatpush3.bf16.msra.mxu0 %v2020_v7 }
  0xab   : > { %1823 = vmatprep.subr.bf16.mxu0 %v2023_v10 }
  0xae   : > { %1824 = vmatpush3.bf16.msra.mxu0 %v2024_v11 }
  0xaf   : > { %1825 = vmatprep.subr.bf16.mxu0 %v2027_v13 }
  0xb2   : > { %1826 = vmatpush3.bf16.msra.mxu0 %v2028_v15 }
  0xb3   : > { %1827 = vmatprep.subr.bf16.mxu0 %v2031_v17 }
  0xb6   : > { %1828 = vmatpush3.bf16.msra.mxu0 %v2032_v19 }
  0xb7   : > { %1829 = vmatprep.subr.bf16.mxu0 %v2035_v21 }
  0xba   : > { %1830 = vmatpush3.bf16.msra.mxu0 %v2036_v23 }
  0xbb   : > { %1831 = vmatprep.subr.bf16.mxu0 %v2039_v25 }
  0xbe   : > { %1832 = vmatpush3.bf16.msra.mxu0 %v2040_v27 }
  0xbf   : > { %1833 = vmatprep.subr.bf16.mxu0 %v2043_v31 }
  0xc2   : > { %1834 = vmatpush3.bf16.msra.mxu0 %v2044_v35 }
 0x145   : > { %v1760_v36 = vpop.f32.mrf.mxu0 }
 0x147   : > { %v1761_v39 = vpop.f32.mrf.mxu0 }
 0x148   : > { %v1762_v43 = vadd.f32 %v1761_v39, %v1760_v36 }
 0x149   : > { %v1782_v40 = vpop.f32.mrf.mxu1  ;;  %v1763_v41 = vpop.f32.mrf.mxu0 }
 0x14a   : > { %v889_v47 = vadd.f32 %v1762_v43, %v1637_v44 }
 0x14b   : > { %v1783_v42 = vpop.f32.mrf.mxu1  ;;  %v1764_v45 = vpop.f32.mrf.mxu0 }
 0x14c   : > { %v1784_v48 = vadd.f32 %v1783_v42, %v1782_v40  ;;  %v1765_v49 = vadd.f32 %v1764_v45, %v1763_v41 }
 0x14d   : > { %v1785_v46 = vpop.f32.mrf.mxu1 }
 0x14e   : > { %v892_v51 = vadd.f32 %v1765_v49, %v1637_v44  ;;  %v930_v53 = vadd.f32 %v1784_v48, %v889_v47 }
 0x14f   : > { %v1786_v50 = vpop.f32.mrf.mxu1 }
 0x150   : > { %v1787_v52 = vadd.f32 %v1786_v50, %v1785_v46 }
 0x152   : > { %v933_v58 = vadd.f32 %v1787_v52, %v892_v51 }
 0x165   : > { %v970_v54 = vpop.f32.mrf.mxu0 }
 0x166   : > { %v971_v55 = vadd.f32 %v970_v54, %v930_v53 }
 0x167   : > { %v1868_v56 = vpop.f32.mrf.mxu0 }
 0x168   : > { %vm977_vm0 = vcmp.ge.f32.partialorder %v971_v55, 0.0  ;;  %v979_v57 = vmul.f32 0.2, %v971_v55 }
 0x169   : > { %v973_v59 = vpop.f32.mrf.mxu0 }
 0x16a   : > { %v981_v60 = vsel %vm977_vm0, %v971_v55, %v979_v57  ;;  %v974_v62 = vadd.f32 %v973_v59, %v933_v58 }
 0x16b   : > { %v1741_v63 = vpack.c.bf16 %v981_v60, %v981_v60  ;;  %v1869_v0 = vpop.f32.mrf.mxu0 }
 0x16c   : > { %vm978_vm1 = vcmp.ge.f32.partialorder %v974_v62, 0.0  ;;  %v980_v1 = vmul.f32 0.2, %v974_v62 }
 0x16d   : > { %v989_v2 = vrot.slane %v1741_v63, 7 }
 0x16e   : > { %v982_v3 = vsel %vm978_vm1, %v974_v62, %v980_v1 }
 0x16f   : > { %997 = vst [vmem:[#allocation2] sm:$0xe] %v989_v2  ;;  %v1742_v4 = vpack.c.bf16 %v982_v3, %v982_v3  ;;  %v990_v6 = vrot.slane %v989_v2, 4 }
 0x171   : > { %v991_v7 = vrot.slane %v1742_v4, 7 }
 0x173   : > { %v992_v8 = vsel %vm2407_vm2, %v990_v6, %v991_v7  ;;  %v993_v9 = vrot.slane %v991_v7, 4 }
 0x174   : > { %998 = vst [vmem:[#allocation2 + $0x4] sm:$0xf] %v992_v8 }
 0x175   : > { %999 = vst [vmem:[#allocation2 + $0x8] sm:$0x1] %v993_v9 }
 0x176   : > { %v1000_v10 = vld [vmem:[#allocation2] sm:$0xf] }
 0x177   : > { %v1004_v11 = vld [vmem:[#allocation2] sm:$0xf]  ;;  %1002 = vst [vmem:[#allocation3] sm:$0xf] %v1000_v10 }
 0x178   : > { %v1008_v12 = vshrl.u32 %v1004_v11, 16  ;;  %v1011_v13 = vshll.u32 %v1004_v11, 16  ;;  %v1035_v14 = vld [vmem:[#allocation2] sm:$0xe] }
 0x179   : > { %v1052_v15 = vld [vmem:[#allocation2] sm:$0xe]  ;;  %v1685_v20 = vrot.slane %v1035_v14, 9 }
 0x17a   : > { %v1056_v16 = vshrl.u32 %v1052_v15, 16  ;;  %v1059_v17 = vshll.u32 %v1052_v15, 16  ;;  %v1010_v18 = vrot.slane %v1008_v12, 4  ;;  %v1013_v19 = vrot.slane %v1011_v13, 5  ;;  %v1087_v23 = vld [vmem:[#allocation2] sm:$0xc] }
 0x17b   : > { %v1001_v38 = vld [vmem:[#allocation2 + $0x4] sm:$0xf]  ;;  %v1686_v42 = vrot.slane %v1087_v23, 10  ;;  %v2051_v13 = vld [vmem:[#allocation9 + $0x138] sm:$0xff]  }
 0x17c   : > { %v1058_v21 = vrot.slane %v1056_v16, 5  ;;  %v1061_v22 = vrot.slane %v1059_v17, 6  ;;  %v1005_v24 = vld [vmem:[#allocation2 + $0x4] sm:$0xf]  ;;  %v1014_v25 = vor.u32 %v1013_v19, %v1010_v18  ;;  %1003 = vst [vmem:[#allocation3 + $0x14] sm:$0xf] %v1001_v38 }
 0x17d   : > { %v1036_v26 = vld [vmem:[#allocation2 + $0x4] sm:$0xf]  ;;  %v1006_v27 = vld [vmem:[#allocation2 + $0x8] sm:$0x1]  ;;  %v1017_v29 = vshll.u32 %v1005_v24, 16  ;;  %v1021_v31 = vshrl.u32 %v1005_v24, 16 }
 0x17e   : > { %v1037_v34 = vld [vmem:[#allocation2 + $0x8] sm:$0x1]  ;;  %v1062_v35 = vor.u32 %v1061_v22, %v1058_v21  ;;  %v1015_v36 = vrot.slane %v1014_v25, 4  ;;  %v1043_v39 = vrot.slane %v1036_v26, 5  ;;  %v1053_v41 = vld [vmem:[#allocation2 + $0x4] sm:$0xf] }
 0x17f   : > { %v1046_v40 = vrot.slane %v1037_v34, 5  ;;  %v1019_v43 = vrot.slane %v1017_v29, 5  ;;  %v1023_v44 = vrot.slane %v1021_v31, 4  ;;  %v1027_v45 = vshll.u32 %v1006_v27, 16  ;;  %v1054_v46 = vld [vmem:[#allocation2 + $0x8] sm:$0x3] }
 0x180   : > { %v1065_v47 = vshrl.u32 %v1053_v41, 16  ;;  %v1044_v48 = vsel %vm2415_vm11, %v1685_v20, %v1043_v39  ;;  %v1045_v49 = vrot.slane %v1043_v39, 4  ;;  %v1063_v50 = vrot.slane %v1062_v35, 4  ;;  %v1088_v52 = vld [vmem:[#allocation2 + $0x4] sm:$0xf]  ;;  %v2052_v17 = vld [vmem:[#allocation9 + $0x130] sm:$0xff]  }
 0x181   : > { %v1068_v51 = vshll.u32 %v1053_v41, 16  ;;  %v1020_v53 = vsel %vm2421_vm12, %v1015_v36, %v1019_v43  ;;  %v1024_v54 = vor.u32 %v1023_v44, %v1019_v43  ;;  %1050 = vst [vmem:[#allocation3 + $0x8] sm:$0xf] %v1044_v48  ;;  %v1075_v56 = vshrl.u32 %v1054_v46, 16  ;;  %v1089_v57 = vld [vmem:[#allocation2 + $0x8] sm:$0x3] }
 0x182   : > { %v1067_v55 = vrot.slane %v1065_v47, 5  ;;  %1033 = vst [vmem:[#allocation3 + $0x4] sm:$0xf] %v1020_v53  ;;  %v1047_v58 = vsel %vm2415_vm11, %v1045_v49, %v1046_v40  ;;  %v1078_v60 = vshll.u32 %v1054_v46, 16  ;;  %v1095_v62 = vrot.slane %v1088_v52, 6  ;;  %v2055_v18 = vld [vmem:[#allocation9 + $0x118] sm:$0xff]  }
 0x183   : > { %v1070_v59 = vrot.slane %v1068_v51, 6  ;;  %v1025_v63 = vrot.slane %v1024_v54, 4  ;;  %v1029_v0 = vrot.slane %v1027_v45, 5  ;;  %1051 = vst [vmem:[#allocation3 + $0x1c] sm:$0xf] %v1047_v58  ;;  %v1077_v1 = vrot.slane %v1075_v56, 5 }
 0x184   : > { %v1098_v2 = vrot.slane %v1089_v57, 6  ;;  %v1080_v4 = vrot.slane %v1078_v60, 6  ;;  %v1096_v6 = vsel %vm2433_vm13, %v1686_v42, %v1095_v62  ;;  %v1097_v7 = vrot.slane %v1095_v62, 4  ;;  %v2045_v14 = vld [vmem:[#allocation3] ss:$20 sps:$4 sm:$0xff]   ;;  %v2056_v19 = vld [vmem:[#allocation9 + $0x110] sm:$0xff]  }
 0x185   : > { %v1071_v3 = vor.u32 %v1070_v59, %v1067_v55  ;;  %v1030_v8 = vsel %vm2421_vm12, %v1025_v63, %v1029_v0  ;;  %1102 = vst [vmem:[#allocation3 + $0x10] sm:$0xf] %v1096_v6  ;;  %v2057_v20 = vld [vmem:[#allocation9 + $0x108] sm:$0xff]   ;;  %v2058_v21 = vld [vmem:[#allocation9 + $0x100] sm:$0xff]  }
 0x186   : > { %1034 = vst [vmem:[#allocation3 + $0x18] sm:$0xf] %v1030_v8  ;;  %v1081_v10 = vor.u32 %v1080_v4, %v1077_v1  ;;  %v1099_v11 = vsel %vm2433_vm13, %v1097_v7, %v1098_v2  ;;  %v1732_v42 = vld [vmem:[%s2553_s4] ss:$0 sm:$0xff] }
 0x187   : > { %v1072_v61 = vsel %vm2439_vm14, %v1063_v50, %v1071_v3  ;;  %v1073_v9 = vrot.slane %v1071_v3, 4  ;;  %1103 = vst [vmem:[#allocation3 + $0x24] sm:$0xf] %v1099_v11 }
 0x188   : > { %1085 = vst [vmem:[#allocation3 + $0xc] sm:$0xf] %v1072_v61 }
 0x189   : > { %v1082_v12 = vsel %vm2439_vm14, %v1073_v9, %v1081_v10 }
 0x18a   : > { %1086 = vst [vmem:[#allocation3 + $0x20] sm:$0xf] %v1082_v12  ;;  %v2048_v15 = vld [vmem:[#allocation3 + $0x8] ss:$20 sps:$4 sm:$0xff]  }
 0x18d   : > { %v2047_v5 = vld [vmem:[#allocation3 + $0x4] ss:$20 sps:$4 sm:$0xff]  }
 0x18e   : > { %1408 = vmatprep.mubr.bf16.mxu1 %v2047_v5  ;;  %v2059_v22 = vld [vmem:[#allocation3 + $0x10] ss:$20 sps:$4 sm:$0xff]  }
 0x18f   : > { %1409 = vmatmul.mubr.bf16.vlgmr.msra.gmra.mxu1 %v2045_v14 }
 0x190   : > { %1871 = vmatpush3.bf16.msra.mxu1 %v2051_v13  ;;  %1886 = vmatprep.mubr.msk.bf16.mxu1 %vm2219_vm15, %v2218_v37 }
 0x191   : > { %v2050_v16 = vld [vmem:[#allocation3 + $0xc] ss:$20 sps:$4 sm:$0xff]   ;;  %1872 = vmatprep.subr.bf16.mxu1 %v2218_v37 }
 0x192   : > { %1449 = vmatprep.mubr.bf16.mxu0 %v2050_v16 }
 0x193   : > { %1450 = vmatmul.mubr.bf16.vlgmr.msra.gmra.mxu0 %v2048_v15 }
 0x194   : > { %1873 = vmatpush3.bf16.msra.mxu1 %v2052_v17 }
 0x195   : > { %1874 = vmatprep.subr.bf16.mxu1 %v2218_v37 }
 0x198   : > { %1875 = vmatpush3.bf16.msra.mxu1 %v2053_v28 }
 0x199   : > { %1876 = vmatprep.subr.bf16.mxu1 %v2218_v37 }
 0x19c   : > { %1877 = vmatpush3.bf16.msra.mxu1 %v2054_v30 }
 0x19d   : > { %1878 = vmatprep.subr.bf16.mxu1 %v2218_v37 }
 0x1a0   : > { %1879 = vmatpush3.bf16.msra.mxu1 %v2055_v18 }
 0x1a1   : > { %1880 = vmatprep.subr.bf16.mxu1 %v2218_v37 }
 0x1a4   : > { %1881 = vmatpush3.bf16.msra.mxu1 %v2056_v19 }
 0x1a5   : > { %1882 = vmatprep.subr.bf16.mxu1 %v2218_v37 }
 0x1a8   : > { %1883 = vmatpush3.bf16.msra.mxu1 %v2057_v20 }
 0x1a9   : > { %1884 = vmatprep.subr.bf16.mxu1 %v2218_v37 }
 0x1ac   : > { %1885 = vmatpush3.bf16.msra.mxu1 %v2058_v21 }
 0x1af   : > { %1887 = vmatmul.mubr.bf16.vlgmr.msra.gmra.mxu1 %v2059_v22 }
 0x24f   : > { %v1813_v23 = vpop.f32.mrf.mxu1 }
 0x251   : > { %v1814_v24 = vpop.f32.mrf.mxu1 }
 0x252   : > { %v1815_v29 = vadd.f32 %v1814_v24, %v1813_v23 }
 0x253   : > { %v1835_v38 = vpop.f32.mrf.mxu0  ;;  %v1816_v26 = vpop.f32.mrf.mxu1 }
 0x255   : > { %v1836_v25 = vpop.f32.mrf.mxu0  ;;  %v1817_v34 = vpop.f32.mrf.mxu1 }
 0x256   : > { %v1837_v31 = vadd.f32 %v1836_v25, %v1835_v38  ;;  %v1818_v36 = vadd.f32 %v1817_v34, %v1816_v26 }
 0x257   : > { %v1838_v27 = vpop.f32.mrf.mxu0 }
 0x258   : > { %v1452_v40 = vadd.f32 %v1837_v31, %v1815_v29 }
 0x259   : > { %v1839_v35 = vpop.f32.mrf.mxu0 }
 0x25a   : > { %v1840_v39 = vadd.f32 %v1839_v35, %v1838_v27 }
 0x25c   : > { %v1455_v45 = vadd.f32 %v1840_v39, %v1818_v36 }
 0x26f   : > { %v1492_v41 = vpop.f32.mrf.mxu1 }
 0x270   : > { %v1493_v37 = vadd.f32 %v1492_v41, %v1452_v40 }
 0x271   : > { %v1888_v43 = vpop.f32.mrf.mxu1 }
 0x272   : > { %v1501_v44 = vadd.f32 %v1493_v37, %v2397_v32 }
 0x273   : > { %v1495_v46 = vpop.f32.mrf.mxu1 }
 0x274   : > { %v1510_v47 = vadd.f32 %v1732_v42, %v1501_v44  ;;  %v1496_v48 = vadd.f32 %v1495_v46, %v1455_v45 }
 0x275   : > { %v1889_v49 = vpop.f32.mrf.mxu1 }
 0x276   : > { %1512 = vst [vmem:[%s271_s11] sm:$0xff] %v1510_v47  ;;  %v1502_v50 = vadd.f32 %v1496_v48, %v2400_v33 }
 0x278   : > { %v1511_v32 = vadd.f32 %v1732_v42, %v1502_v50 }
 0x27a   : > { %1513 = vst [vmem:[%s271_s11 + $0x8] sm:$0xff] %v1511_v32 }
 0x27b   : > { %2153 = shalt.err (!%p2150_p9)
}
 0x27c   : > { %s2154_s30 = scalar_lea.hbm %s2506_s9, 256  ;;  %s2158_s8 = scalar_lea.hbm %s2554_s5, 512 }
 0x27d   : > { %p2155_p13 = scmp.ne.s32.totalorder %s2506_s9, %s2154_s30  ;;  %p2159_p4 = scmp.lt.s32.totalorder %s2506_s9, %s2554_s5 }
 0x27e   : > { %p2160_p8 = scmp.lt.s32.totalorder %s2158_s8, %s2154_s30 }
 0x27f   : > { %p2156_p5 = pnand %p2155_p13, %p2580_p10 }
 0x280   : > { %p2161_p3 = por %p2160_p8, %p2159_p4 }
 0x281   : > { %p2157_p0 = pneg %p2156_p5 }
 0x283   : > { %p2162_p11 = pnand %p2161_p3, %p2157_p0 }
 0x285   : > { %2165 = shalt.err (!%p2162_p11)
}
 0x286   : > { %s2221_s28 = smov 128   ;;  %s2222_s6 = smov 8  }
 0x287   : > { %1900 = dma.vmem_to_hbm [thread:$0]  (%p2580_p10), %s2500_s12, 256, %s2506_s9, %s1515_s13, %s2221_s28, %s2221_s28, %s2222_s6  }
 0x288 PF: > { %s1543_s7 = sand.u32 1, %s2196_s18   ;;  %p2581_p1 = scmp.ne.s32.totalorder %s2560_s25, 0 }
 0x289   : > { %p2582_p2 = scmp.ge.s32.totalorder %s2208_s21, 2  ;;  %s1544_s14 = scalar_lea.sflag [#allocation6], %s1543_s7 }
 0x28b   : > { %p1914_p6 = pnand %p2582_p2, %p2581_p1 }
 0x28d   : > { %p1915_p12 = pneg %p1914_p6 }
 0x28f   : > { %2191 = dma.done.wait (%p1915_p12), %s1544_s14, 256  }
 0x290   : > { %2193 = vsyncadd (%p1915_p12), %s1544_s14, 4294967040  ;;  %p19_p7 = scmp.ge.s32.totalorder %s2325_s15, 4   ;;  %s2583_s18 = smov %s2200_s19 }
 0x291   : > { %s2584_s19 = smov %s2204_s20  ;;  %s2585_s20 = smov %s2341_s27 }
 0x292   : > { %s2586_s21 = smov %s2325_s15  ;;  %21 = sbr.rel (!%p19_p7) target bundleno = 6 (0x6), region = 93 }
 0x297   :  { %1549 = vsyncpa [#allocation5], 1 }
 0x298   :  { %1551 = vsyncpa [#allocation5 + $0x1], 1 }
 0x299   :  { %1552 = vsyncpa [#allocation8], 1 }
 0x29a   :  { %1553 = vsyncpa [#allocation6], 1 }
 0x29b   :  { %1555 = vsyncpa [#allocation6 + $0x1], 1 }

</bundles_post_ra>
